<compile_context>
chip_gen: v6e
topology: v6e:2x2x1
jax: 0.10.0
libtpu: 0.0.40
codegen_flags: <defaults>
</compile_context>

<pallas_src>
import jax
import jax.numpy as jnp
from jax import lax
from jax.experimental import pallas as pl
from jax.experimental.pallas import tpu as pltpu

_EPS = 1e-6
_MAX_SOLVER_POINTS = 64   # fixed-size padding for the (data-dependent) sampled point count

_N_ROWS = 48              # packed input sublanes per pixel
_N_STATS = 16             # accumulated statistics (14 used, padded to 16 sublanes)
_PIXEL_TILE = 2048        # lanes per grid step (multiple of 128)


# --------------------------------------------------------------------------------------
# Fused Pallas kernel: visible + occluded region losses, accumulated over pixel tiles
# --------------------------------------------------------------------------------------
def _make_fused_kernel(hw, tile):
    """hw = number of real pixels (H*W, static); tile = pixel tile width (lanes)."""

    def kernel(al_ref, data_ref, out_ref):
        t = pl.program_id(1)

        @pl.when(t == 0)
        def _init():
            out_ref[...] = jnp.zeros_like(out_ref)

        # per-batch alignment column: rows 0..15 = scale, rows 16..24 = [sx,sy,sz]*3
        al = al_ref[0]                            # (32, 1)
        sc9 = al[0:9, :]                          # (9, 1)
        sh9 = al[16:25, :]                        # (9, 1)

        pin = data_ref[0, 0:9, :]                 # (9, T)  input points  (vis, A, B)
        pout = data_ref[0, 9:18, :]               # (9, T)  output points (vis, A, B)
        cin = data_ref[0, 18:27, :]               # (9, T)  input colors
        cout = data_ref[0, 27:36, :]              # (9, T)  output colors
        alpha = data_ref[0, 36:39, :]             # (3, T)  input alphas
        conf = data_ref[0, 39:42, :]              # (3, T)  output conf logits

        # valid-pixel mask for the zero-padded lane tail (generated from static H*W)
        lane = lax.broadcasted_iota(jnp.int32, (1, tile), 1) + t * tile
        pv = (lane < hw).astype(jnp.float32)      # (1, T)

        aligned = sc9 * pout + sh9                # (9, T)
        absd = jnp.abs(pin - aligned)             # (9, T)
        csq = (cin - cout) ** 2                   # (9, T)

        rm = (alpha > 0.9).astype(jnp.float32)    # (3, T) BCE targets
        m = rm * pv                               # (3, T) valid masks
        # shared transcendental part of BCE-with-logits: log(1 + exp(-|x|))  (EUP)
        sp = jnp.log(1.0 + jnp.exp(-jnp.abs(conf)))   # (3, T)
        reluc = jnp.maximum(conf, 0.0)                # (3, T)

        # ---------------- visible region (layer 0) ----------------
        m0, rm0 = m[0:1], rm[0:1]
        z0 = pin[2:3]
        sd0 = absd[0:1] + absd[1:2] + absd[2:3]
        cs0 = csq[0:1] + csq[1:2] + csq[2:3]
        safe_z0 = jnp.where(m0 > 0, z0, 1.0)
        vis_dist = m0 * sd0 / safe_z0
        vis_cnt = m0
        vis_col = m0 * cs0
        vis_conf = pv * (reluc[0:1] - conf[0:1] * rm0 + sp[0:1])

        # ---------------- occluded region (layers 1..2 = A, B) ----------------
        mA, mB = m[1:2], m[2:3]
        rmA, rmB = rm[1:2], rm[2:3]
        length = mA + mB                          # {0,1,2} per pixel
        two = (length > 1.5).astype(jnp.float32)
        one = ((length > 0.5) & (length < 1.5)).astype(jnp.float32)
        zero = (length < 0.5).astype(jnp.float32) * pv

        zA, zB = pin[5:6], pin[8:9]
        sdA = absd[3:4] + absd[4:5] + absd[5:6]
        sdB = absd[6:7] + absd[7:8] + absd[8:9]
        csA = csq[3:4] + csq[4:5] + csq[5:6]
        csB = csq[6:7] + csq[7:8] + csq[8:9]

        # knn (K=1) for input slot A.  The reference calls knn_points with
        # lengths2=None, so BOTH output slots are candidates whenever slot A is valid
        # (length >= 1); padded input slots fetch output slot 0 (zero-filled indices).
        dAA = absd[3:4] ** 2 + absd[4:5] ** 2 + absd[5:6] ** 2
        dfAB = jnp.abs(pin[3:6] - aligned[6:9])   # (3, T)
        dAB = dfAB[0:1] ** 2 + dfAB[1:2] ** 2 + dfAB[2:3] ** 2
        sdAB = dfAB[0:1] + dfAB[1:2] + dfAB[2:3]
        cAB = cin[3:6] - cout[6:9]
        csAB = cAB[0:1] ** 2 + cAB[1:2] ** 2 + cAB[2:3] ** 2
        idx0_is1 = (dAB < dAA) & (length >= 1.0)

        # BCE-with-logits terms, transcendental part shared per conf channel
        bceAA = reluc[1:2] - conf[1:2] * rmA + sp[1:2]
        bceAB = reluc[1:2] - conf[1:2] * rmB + sp[1:2]
        bceBB = reluc[2:3] - conf[2:3] * rmB + sp[2:3]
        bceBA = reluc[2:3] - conf[2:3] * rmA + sp[2:3]

        # -- two valid occluded points
        sz2A = jnp.where(two > 0, zA, 1.0)
        sz2B = jnp.where(two > 0, zB, 1.0)
        two_dist = two * (sdA / sz2A + sdB / sz2B)
        two_cnt = two
        two_col = two * (csA + csB)
        two_conf = two * (bceAA + bceBB)

        # -- exactly one valid occluded point (slot A after z-sorting)
        sz1A = jnp.where(one > 0, zA, 1.0)
        one_dist = one * jnp.where(idx0_is1, sdAB, sdA) / sz1A
        one_cnt = one
        one_col = one * jnp.where(idx0_is1, csAB, csA)
        one_conf = one * (jnp.where(idx0_is1, bceBA, bceAA) + bceAB)

        # -- no valid occluded point (both fetched slots come from output slot A)
        zero_conf = zero * (bceAA + bceAB)
        zero_cnt = zero

        # accumulate per-lane partial sums into the resident output block
        def acc(i, v):
            out_ref[0, i:i + 1, :] += v

        acc(0, vis_dist); acc(1, vis_cnt); acc(2, vis_col); acc(3, vis_conf)
        acc(4, two_dist); acc(5, two_cnt); acc(6, two_col); acc(7, two_conf)
        acc(8, one_dist); acc(9, one_cnt); acc(10, one_col); acc(11, one_conf)
        acc(12, zero_conf); acc(13, zero_cnt)

    return kernel


def _round_up(x, m):
    return ((x + m - 1) // m) * m


def _fused_loss_stats(pts_g, tex_g, out_pts, out_cols, out_confs, scale, shift,
                      tile=_PIXEL_TILE):
    """Packs inputs into one sublane-dense slab and runs the fused loss kernel.

    Returns a length-16 vector of summed statistics:
      [vis_dist, vis_cnt, vis_col, vis_conf,
       two_dist, two_cnt, two_col, two_conf,
       one_dist, one_cnt, one_col, one_conf,
       zero_conf, zero_cnt, 0, 0]
    """
    B, H, W, L, _ = pts_g.shape
    assert L == 3
    hw = H * W
    f32 = jnp.float32

    T = min(tile, _round_up(hw, 128))
    nt = -(-hw // T)
    np_pad = nt * T

    # one sublane-dense slab per batch: single concat + transpose + pad in XLA
    packed = jnp.concatenate([
        pts_g.reshape(B, H, W, 9),                # rows 0-8
        out_pts.reshape(B, H, W, 9),              # rows 9-17
        tex_g[..., :3].reshape(B, H, W, 9),       # rows 18-26
        out_cols.reshape(B, H, W, 9),             # rows 27-35
        tex_g[..., 3],                            # rows 36-38 (alphas)
        out_confs[..., 0],                        # rows 39-41 (conf logits)
        jnp.zeros((B, H, W, 6), f32),             # rows 42-47 (pad)
    ], axis=-1).astype(f32)                       # (B, H, W, 48)
    packed = packed.reshape(B, hw, _N_ROWS).transpose(0, 2, 1)
    packed = jnp.pad(packed, ((0, 0), (0, 0), (0, np_pad - hw)))

    # tiny per-batch alignment column: rows 0..15 = scale, rows 16..24 = [sx,sy,sz]*3
    sc_col = jnp.broadcast_to(scale.reshape(B, 1).astype(f32), (B, 16))
    sh_col = jnp.concatenate(
        [jnp.tile(shift.reshape(B, 3).astype(f32), (1, 3)),
         jnp.zeros((B, 7), f32)], axis=-1)
    align = jnp.concatenate([sc_col, sh_col], axis=-1).reshape(B, 32, 1)

    out = pl.pallas_call(
        _make_fused_kernel(hw, T),
        out_shape=jax.ShapeDtypeStruct((B, _N_STATS, T), f32),
        grid=(B, nt),
        in_specs=[
            pl.BlockSpec((1, 32, 1), lambda b, t: (b, 0, 0)),        # alignment column
            pl.BlockSpec((1, _N_ROWS, T), lambda b, t: (b, 0, t)),   # packed pixel slab
        ],
        out_specs=pl.BlockSpec((1, _N_STATS, T), lambda b, t: (b, 0, 0)),
        compiler_params=pltpu.CompilerParams(
            dimension_semantics=("parallel", "arbitrary")),
    )(align, packed)

    # tiny final reduction (over batch and lanes) done in XLA
    return jnp.sum(out, axis=(0, 2))              # (16,)


# --------------------------------------------------------------------------------------
# Plain-JAX glue (sorting / alignment solver) — no Pallas sort/searchsorted primitives.
# --------------------------------------------------------------------------------------
def gather_valid_points(points, texels, mask_thresh=0.9):
    valid = texels[..., 3:4] > mask_thresh
    zf = jnp.where(valid, points[..., 2:3], jnp.inf)          # (b,h,w,L,1)
    order = jnp.argsort(zf[..., 0], axis=-1)                  # (b,h,w,L) valid-first (z asc)
    idx3 = jnp.broadcast_to(order[..., None], points.shape)
    idx4 = jnp.broadcast_to(order[..., None], texels.shape)
    points_sorted = jnp.take_along_axis(points, idx3, axis=-2)
    texels_sorted = jnp.take_along_axis(texels, idx4, axis=-2)
    return points_sorted, texels_sorted


def _resize_nearest(x, size):
    # F.interpolate(mode='nearest') on the spatial dims of (B, H, W, ...)
    h, w = x.shape[1], x.shape[2]
    ri = (jnp.arange(size) * h) // size
    ci = (jnp.arange(size) * w) // size
    return x[:, ri][:, :, ci]


def _solver_single(P_all, Q_all, mask, coerce_positive_scale, max_n, outlier_thresh):
    eps = _EPS
    N = max_n
    order = jnp.argsort(jnp.logical_not(mask).astype(jnp.int32))   # valid points first
    sel = order[:N]
    valid = mask[sel]
    fill = jnp.array([0.0, 0.0, 1.0], jnp.float32)
    P = jnp.where(valid[:, None], P_all[sel], fill)
    Q = jnp.where(valid[:, None], Q_all[sel], fill)
    Pz = P[:, 2]
    Qz = Q[:, 2]

    P2 = jnp.concatenate([jnp.broadcast_to(P[None, :, :2], (N, N, 2)),
                          (Pz[None, :] - Pz[:, None])[..., None]], axis=-1)
    Q2 = jnp.concatenate([jnp.broadcast_to(Q[None, :, :2], (N, N, 2)),
                          (Qz[None, :] - Qz[:, None])[..., None]], axis=-1)
    P2 = jnp.where(Q2 > 0, P2, -P2)
    Q2 = jnp.where(Q2 > 0, Q2, -Q2)
    qzero = jnp.abs(Q2) < eps
    P2 = jnp.where(qzero, jnp.inf, P2)
    Q2 = jnp.where(qzero, eps, Q2)

    w = (1.0 / (jnp.abs(Pz) + eps))[None, :, None]
    colv = valid[None, :, None]                                   # padded columns -> neutral

    values = jnp.where(colv, w * Q2, 0.0).reshape(N, 3 * N)
    ratio = jnp.where(colv, P2 / (Q2 + eps), jnp.inf).reshape(N, 3 * N)
    ratio_minus = jnp.where(colv, (w * P2 - outlier_thresh) / (w * Q2 + eps), jnp.inf).reshape(N, 3 * N)
    ratio_plus = jnp.where(colv, (w * P2 + outlier_thresh) / (w * Q2 + eps), jnp.inf).reshape(N, 3 * N)

    def sorted_cumsum(r):
        si = jnp.argsort(r, axis=-1)
        r_sorted = jnp.take_along_axis(r, si, axis=-1)
        c = jnp.cumsum(jnp.take_along_axis(values, si, axis=-1), axis=-1)
        c = jnp.concatenate([jnp.zeros((N, 1)), c, jnp.full((N, 1), jnp.inf)], axis=-1)
        return r_sorted, c

    r_s, c_s = sorted_cumsum(ratio)
    rm_s, cm_s = sorted_cumsum(ratio_minus)
    rp_s, cp_s = sorted_cumsum(ratio_plus)

    ss_l = jax.vmap(lambda s, q: jnp.searchsorted(s, q, side='left'))
    ss_r = jax.vmap(lambda s, q: jnp.searchsorted(s, q, side='right'))
    g = lambda c, i: jnp.take_along_axis(c, i, axis=-1)

    left_grad = 2 * g(c_s, ss_l(r_s, ratio)) - g(cm_s, ss_l(rm_s, ratio)) - g(cp_s, ss_l(rp_s, ratio))
    right_grad = 2 * g(c_s, ss_r(r_s, ratio)) - g(cm_s, ss_r(rm_s, ratio)) - g(cp_s, ss_r(rp_s, ratio))

    extrema = (left_grad < -eps) & (eps <= right_grad) & jnp.isfinite(ratio) & valid[:, None]
    if coerce_positive_scale:
        extrema = extrema & (ratio > 0)

    scale_cand = ratio
    shiftz_cand = Pz[:, None] - scale_cand * Qz[:, None]

    wcost = jnp.where(valid, 1.0 / jnp.abs(Pz), 0.0)
    s3 = scale_cand[:, :, None]
    t3 = shiftz_cand[:, :, None]
    s3f = jnp.where(jnp.isfinite(s3), s3, 0.0)
    t3f = jnp.where(jnp.isfinite(t3), t3, 0.0)
    cost = jnp.sum((jnp.abs(P[None, None, :, 0] - s3f * Q[None, None, :, 0])
                    + jnp.abs(P[None, None, :, 1] - s3f * Q[None, None, :, 1])
                    + jnp.abs(P[None, None, :, 2] - s3f * Q[None, None, :, 2] - t3f))
                   * wcost[None, None, :], axis=-1)
    cost = jnp.where(extrema, cost, jnp.inf)

    best = jnp.argmin(cost.reshape(-1))
    any_cand = jnp.any(extrema)
    best_scale = scale_cand.reshape(-1)[best]
    best_shiftz = shiftz_cand.reshape(-1)[best]
    ret_scale = jnp.where(any_cand, best_scale, 1.0)
    ret_shift = jnp.where(any_cand,
                          jnp.concatenate([jnp.zeros((2,), jnp.float32), best_shiftz[None]]),
                          jnp.zeros((3,), jnp.float32))
    # TODO(synk): the torch no-solution fallback performs a quirky per-point z-shift search;
    # here the fallback is identity alignment (scale=1, shift=0).
    return ret_scale, ret_shift


def optimal_alignment_solver(input_points, output_points, valid_masks, rng_key,
                             process_size=64, mask_sparsify_ratio=0.99,
                             outlier_thresh=10.0, coerce_positive_scale=False,
                             max_n=_MAX_SOLVER_POINTS):
    B = input_points.shape[0]
    ip = _resize_nearest(input_points, process_size).reshape(B, -1, 3)
    op = _resize_nearest(output_points, process_size).reshape(B, -1, 3)
    vm = _resize_nearest(valid_masks.astype(jnp.float32)[..., None], process_size)[..., 0]
    vm = vm.reshape(B, -1) > 0.5
    # TODO(synk): mask sparsification uses jax.random instead of torch.rand_like (RNG differs),
    # and the data-dependent point count is capped at max_n (expected ~1% of 4096 << max_n).
    vm = vm & (jax.random.uniform(rng_key, vm.shape) > mask_sparsify_ratio)
    solve = jax.vmap(lambda p, q, m: _solver_single(p, q, m, coerce_positive_scale,
                                                    max_n, outlier_thresh))
    scale, shift = solve(ip, op, vm)
    return lax.stop_gradient(scale), lax.stop_gradient(shift)


# --------------------------------------------------------------------------------------
# Module
# --------------------------------------------------------------------------------------
class OptimalAlignmentLoss:
    def __init__(self, visible_weight=1.0, occlusion_weight=1.0, dist_weight=1.0,
                 color_weight=1.0, conf_weight=1.0, coerce_positive_scale_alignment=False):
        self.visible_weight = visible_weight
        self.occlusion_weight = occlusion_weight
        self.dist_weight = dist_weight
        self.color_weight = color_weight
        self.conf_weight = conf_weight
        self.coerce_positive_scale_alignment = coerce_positive_scale_alignment

    def __call__(self, input_dict, output_dict, rng_key):
        pts_g, tex_g = gather_valid_points(input_dict['points_rendered'],
                                           input_dict['texels_rendered'], 0.9)
        input_masks = input_dict['texels_rendered'][:, :, :, 0, 3] > 0.9
        out_pts = output_dict['points']
        B, H, W, L, C = pts_g.shape
        assert C == 3 and pts_g.shape == out_pts.shape and input_masks.shape == (B, H, W)
        assert L - 1 == 2, "occluded loss requires occ == 2 (layers == 3)"

        scale, shift = optimal_alignment_solver(
            pts_g[:, :, :, 0, :], out_pts[:, :, :, 0, :], input_masks, rng_key,
            coerce_positive_scale=self.coerce_positive_scale_alignment)

        stats = _fused_loss_stats(pts_g, tex_g, out_pts,
                                  output_dict['colors'], output_dict['confs'],
                                  scale, shift)

        npix = float(B * H * W)
        cnt = stats[1]
        vis_dist = jnp.where(cnt > 0, stats[0] / (3.0 * cnt), 0.0) * self.dist_weight
        vis_color = jnp.where(cnt > 0, stats[2] / (3.0 * cnt), 0.0) * self.color_weight
        vis_conf = jnp.where(cnt > 0, stats[3] / npix, 0.0) * self.conf_weight

        tc, oc, zc = stats[5], stats[9], stats[13]
        occ_dist = (jnp.where(tc > 0, stats[4] / (6.0 * tc), 0.0)
                    + jnp.where(oc > 0, stats[8] / (3.0 * oc), 0.0)) * self.dist_weight
        occ_color = (jnp.where(tc > 0, stats[6] / (6.0 * tc), 0.0)
                     + jnp.where(oc > 0, stats[10] / (3.0 * oc), 0.0)) * self.color_weight
        occ_conf = (jnp.where(tc > 0, stats[7] / (2.0 * tc), 0.0)
                    + jnp.where(oc > 0, stats[11] / (2.0 * oc), 0.0)
                    + jnp.where(zc > 0, stats[12] / (2.0 * zc), 0.0)) * self.conf_weight

        return {
            'visible_dist_loss': vis_dist * self.visible_weight,
            'visible_color_loss': vis_color * self.visible_weight,
            'visible_conf_loss': vis_conf * self.visible_weight,
            'occluded_dist_loss': occ_dist * self.occlusion_weight,
            'occluded_color_loss': occ_color * self.occlusion_weight,
            'occluded_conf_loss': occ_conf * self.occlusion_weight,
        }


# --------------------------------------------------------------------------------------
if __name__ == "__main__":
    key = jax.random.PRNGKey(0)
    ks = jax.random.split(key, 8)
    B, H, W, L = 2, 16, 16, 3

    z_off = jnp.array([0.0, 0.0, 3.0], jnp.float32)
    points_rendered = jax.random.normal(ks[0], (B, H, W, L, 3), jnp.float32) + z_off
    alphas = (jax.random.uniform(ks[1], (B, H, W, L, 1)) > 0.3).astype(jnp.float32)
    colors_in = jax.random.uniform(ks[2], (B, H, W, L, 3), jnp.float32)
    texels_rendered = jnp.concatenate([colors_in, alphas], axis=-1)

    out_points = jax.random.normal(ks[3], (B, H, W, L, 3), jnp.float32) + z_off
    out_colors = jax.random.uniform(ks[4], (B, H, W, L, 3), jnp.float32)
    out_confs = jax.random.normal(ks[5], (B, H, W, L, 1), jnp.float32)

    loss_fn = OptimalAlignmentLoss()
    losses = loss_fn(
        {'points_rendered': points_rendered, 'texels_rendered': texels_rendered},
        {'points': out_points, 'colors': out_colors, 'confs': out_confs},
        rng_key=ks[6])

    jax.block_until_ready(losses)
    print("KERNEL_OK")
</pallas_src>

<mosaic_0001>
module attributes {stable_mosaic.version = 11 : i64} {
  func.func @kernel(%arg0: i32, %arg1: i32, %arg2: memref<1x32x1xf32, #tpu.memory_space<vmem>>, %arg3: memref<1x48x256xf32, #tpu.memory_space<vmem>>, %arg4: memref<1x16x256xf32, #tpu.memory_space<vmem>>) attributes {dimension_semantics = [#tpu.dimension_semantics<parallel>, #tpu.dimension_semantics<arbitrary>], iteration_bounds = array<i64: 2, 1>, scalar_prefetch = 0 : i64, scratch_operands = 0 : i64, tpu.core_type = #tpu.core_type<tc>, window_params = [{transform_indices = @transform_0, window_bounds = array<i64: 1, 32, 1>}, {transform_indices = @transform_1, window_bounds = array<i64: 1, 48, 256>}, {transform_indices = @transform_2, window_bounds = array<i64: 1, 16, 256>}]} {
    %c0_i32 = arith.constant 0 : i32
    %0 = arith.cmpi eq, %arg1, %c0_i32 : i32
    %1 = arith.extui %0 : i1 to i32
    %c0_i32_0 = arith.constant 0 : i32
    %2 = arith.cmpi ne, %1, %c0_i32_0 : i32
    scf.if %2 {
      %cst_105 = arith.constant 0.000000e+00 : f32
      %298 = vector.broadcast %cst_105 : f32 to vector<1x16x256xf32>
      %c0_106 = arith.constant 0 : index
      %c0_107 = arith.constant 0 : index
      %c0_108 = arith.constant 0 : index
      %299 = vector.load %arg4[%c0_106, %c0_107, %c0_108] : memref<1x16x256xf32, #tpu.memory_space<vmem>>, vector<1x16x256xf32>
      tpu.vector_store %arg4[%c0_106, %c0_107, %c0_108], %298 {strides = array<i32>} : memref<1x16x256xf32, #tpu.memory_space<vmem>>, vector<1x16x256xf32>,
    } else {
    }
    %c0 = arith.constant 0 : index
    %c0_1 = arith.constant 0 : index
    %c0_2 = arith.constant 0 : index
    %3 = vector.load %arg2[%c0, %c0_1, %c0_2] : memref<1x32x1xf32, #tpu.memory_space<vmem>>, vector<1x32x1xf32>
    %4 = vector.shape_cast %3 : vector<1x32x1xf32> to vector<32x1xf32>
    %5 = vector.extract_strided_slice %4 {offsets = [0, 0], sizes = [9, 1], strides = [1, 1]} : vector<32x1xf32> to vector<9x1xf32>
    %6 = vector.extract_strided_slice %4 {offsets = [16, 0], sizes = [9, 1], strides = [1, 1]} : vector<32x1xf32> to vector<9x1xf32>
    %c0_3 = arith.constant 0 : index
    %c0_4 = arith.constant 0 : index
    %c0_5 = arith.constant 0 : index
    %7 = vector.load %arg3[%c0_3, %c0_4, %c0_5] : memref<1x48x256xf32, #tpu.memory_space<vmem>>, vector<1x9x256xf32>
    %8 = vector.shape_cast %7 : vector<1x9x256xf32> to vector<9x256xf32>
    %c0_6 = arith.constant 0 : index
    %c9 = arith.constant 9 : index
    %c0_7 = arith.constant 0 : index
    %9 = vector.load %arg3[%c0_6, %c9, %c0_7] : memref<1x48x256xf32, #tpu.memory_space<vmem>>, vector<1x9x256xf32>
    %10 = vector.shape_cast %9 : vector<1x9x256xf32> to vector<9x256xf32>
    %c0_8 = arith.constant 0 : index
    %c18 = arith.constant 18 : index
    %c0_9 = arith.constant 0 : index
    %11 = vector.load %arg3[%c0_8, %c18, %c0_9] : memref<1x48x256xf32, #tpu.memory_space<vmem>>, vector<1x9x256xf32>
    %12 = vector.shape_cast %11 : vector<1x9x256xf32> to vector<9x256xf32>
    %c0_10 = arith.constant 0 : index
    %c27 = arith.constant 27 : index
    %c0_11 = arith.constant 0 : index
    %13 = vector.load %arg3[%c0_10, %c27, %c0_11] : memref<1x48x256xf32, #tpu.memory_space<vmem>>, vector<1x9x256xf32>
    %14 = vector.shape_cast %13 : vector<1x9x256xf32> to vector<9x256xf32>
    %c0_12 = arith.constant 0 : index
    %c36 = arith.constant 36 : index
    %c0_13 = arith.constant 0 : index
    %15 = vector.load %arg3[%c0_12, %c36, %c0_13] : memref<1x48x256xf32, #tpu.memory_space<vmem>>, vector<1x3x256xf32>
    %16 = vector.shape_cast %15 : vector<1x3x256xf32> to vector<3x256xf32>
    %c0_14 = arith.constant 0 : index
    %c39 = arith.constant 39 : index
    %c0_15 = arith.constant 0 : index
    %17 = vector.load %arg3[%c0_14, %c39, %c0_15] : memref<1x48x256xf32, #tpu.memory_space<vmem>>, vector<1x3x256xf32>
    %18 = vector.shape_cast %17 : vector<1x3x256xf32> to vector<3x256xf32>
    %19 = tpu.iota {dimensions = array<i32: 1>} : vector<1x256xi32>
    %c256_i32 = arith.constant 256 : i32
    %20 = arith.muli %arg1, %c256_i32 : i32
    %21 = vector.broadcast %20 : i32 to vector<1x256xi32>
    %22 = arith.addi %19, %21 : vector<1x256xi32>
    %c256_i32_16 = arith.constant 256 : i32
    %23 = vector.broadcast %c256_i32_16 : i32 to vector<1x256xi32>
    %24 = arith.cmpi slt, %22, %23 : vector<1x256xi32>
    %25 = arith.extui %24 : vector<1x256xi1> to vector<1x256xi32>
    %26 = arith.sitofp %25 : vector<1x256xi32> to vector<1x256xf32>
    %27 = vector.broadcast %5 : vector<9x1xf32> to vector<9x256xf32>
    %28 = arith.mulf %27, %10 : vector<9x256xf32>
    %29 = vector.broadcast %6 : vector<9x1xf32> to vector<9x256xf32>
    %30 = arith.addf %28, %29 : vector<9x256xf32>
    %31 = arith.subf %8, %30 : vector<9x256xf32>
    %32 = math.absf %31 : vector<9x256xf32>
    %33 = arith.subf %12, %14 : vector<9x256xf32>
    %34 = arith.mulf %33, %33 : vector<9x256xf32>
    %cst = arith.constant 0.899999976 : f32
    %35 = vector.broadcast %cst : f32 to vector<3x256xf32>
    %36 = arith.cmpf ogt, %16, %35 : vector<3x256xf32>
    %37 = arith.extui %36 : vector<3x256xi1> to vector<3x256xi32>
    %38 = arith.sitofp %37 : vector<3x256xi32> to vector<3x256xf32>
    %39 = vector.broadcast %26 : vector<1x256xf32> to vector<3x256xf32>
    %40 = arith.mulf %38, %39 : vector<3x256xf32>
    %41 = math.absf %18 : vector<3x256xf32>
    %cst_17 = arith.constant 0.000000e+00 : f32
    %42 = vector.broadcast %cst_17 : f32 to vector<3x256xf32>
    %43 = arith.subf %42, %41 : vector<3x256xf32>
    %44 = math.exp %43 : vector<3x256xf32>
    %cst_18 = arith.constant 1.000000e+00 : f32
    %45 = vector.broadcast %cst_18 : f32 to vector<3x256xf32>
    %46 = arith.addf %45, %44 : vector<3x256xf32>
    %47 = math.log %46 : vector<3x256xf32>
    %cst_19 = arith.constant 0.000000e+00 : f32
    %48 = vector.broadcast %cst_19 : f32 to vector<3x256xf32>
    %49 = arith.maximumf %18, %48 : vector<3x256xf32>
    %50 = vector.extract_strided_slice %40 {offsets = [0, 0], sizes = [1, 256], strides = [1, 1]} : vector<3x256xf32> to vector<1x256xf32>
    %51 = vector.extract_strided_slice %38 {offsets = [0, 0], sizes = [1, 256], strides = [1, 1]} : vector<3x256xf32> to vector<1x256xf32>
    %52 = vector.extract_strided_slice %8 {offsets = [2, 0], sizes = [1, 256], strides = [1, 1]} : vector<9x256xf32> to vector<1x256xf32>
    %53 = vector.extract_strided_slice %32 {offsets = [0, 0], sizes = [1, 256], strides = [1, 1]} : vector<9x256xf32> to vector<1x256xf32>
    %54 = vector.extract_strided_slice %32 {offsets = [1, 0], sizes = [1, 256], strides = [1, 1]} : vector<9x256xf32> to vector<1x256xf32>
    %55 = arith.addf %53, %54 : vector<1x256xf32>
    %56 = vector.extract_strided_slice %32 {offsets = [2, 0], sizes = [1, 256], strides = [1, 1]} : vector<9x256xf32> to vector<1x256xf32>
    %57 = arith.addf %55, %56 : vector<1x256xf32>
    %58 = vector.extract_strided_slice %34 {offsets = [0, 0], sizes = [1, 256], strides = [1, 1]} : vector<9x256xf32> to vector<1x256xf32>
    %59 = vector.extract_strided_slice %34 {offsets = [1, 0], sizes = [1, 256], strides = [1, 1]} : vector<9x256xf32> to vector<1x256xf32>
    %60 = arith.addf %58, %59 : vector<1x256xf32>
    %61 = vector.extract_strided_slice %34 {offsets = [2, 0], sizes = [1, 256], strides = [1, 1]} : vector<9x256xf32> to vector<1x256xf32>
    %62 = arith.addf %60, %61 : vector<1x256xf32>
    %cst_20 = arith.constant 0.000000e+00 : f32
    %63 = vector.broadcast %cst_20 : f32 to vector<1x256xf32>
    %64 = arith.cmpf ogt, %50, %63 : vector<1x256xf32>
    %cst_21 = arith.constant 1.000000e+00 : f32
    %65 = vector.broadcast %cst_21 : f32 to vector<1x256xf32>
    %66 = arith.select %64, %52, %65 : vector<1x256xi1>, vector<1x256xf32>
    %67 = arith.mulf %50, %57 : vector<1x256xf32>
    %68 = arith.divf %67, %66 : vector<1x256xf32>
    %69 = arith.mulf %50, %62 : vector<1x256xf32>
    %70 = vector.extract_strided_slice %49 {offsets = [0, 0], sizes = [1, 256], strides = [1, 1]} : vector<3x256xf32> to vector<1x256xf32>
    %71 = vector.extract_strided_slice %18 {offsets = [0, 0], sizes = [1, 256], strides = [1, 1]} : vector<3x256xf32> to vector<1x256xf32>
    %72 = arith.mulf %71, %51 : vector<1x256xf32>
    %73 = arith.subf %70, %72 : vector<1x256xf32>
    %74 = vector.extract_strided_slice %47 {offsets = [0, 0], sizes = [1, 256], strides = [1, 1]} : vector<3x256xf32> to vector<1x256xf32>
    %75 = arith.addf %73, %74 : vector<1x256xf32>
    %76 = arith.mulf %26, %75 : vector<1x256xf32>
    %77 = vector.extract_strided_slice %40 {offsets = [1, 0], sizes = [1, 256], strides = [1, 1]} : vector<3x256xf32> to vector<1x256xf32>
    %78 = vector.extract_strided_slice %40 {offsets = [2, 0], sizes = [1, 256], strides = [1, 1]} : vector<3x256xf32> to vector<1x256xf32>
    %79 = vector.extract_strided_slice %38 {offsets = [1, 0], sizes = [1, 256], strides = [1, 1]} : vector<3x256xf32> to vector<1x256xf32>
    %80 = vector.extract_strided_slice %38 {offsets = [2, 0], sizes = [1, 256], strides = [1, 1]} : vector<3x256xf32> to vector<1x256xf32>
    %81 = arith.addf %77, %78 : vector<1x256xf32>
    %cst_22 = arith.constant 1.500000e+00 : f32
    %82 = vector.broadcast %cst_22 : f32 to vector<1x256xf32>
    %83 = arith.cmpf ogt, %81, %82 : vector<1x256xf32>
    %84 = arith.extui %83 : vector<1x256xi1> to vector<1x256xi32>
    %85 = arith.sitofp %84 : vector<1x256xi32> to vector<1x256xf32>
    %cst_23 = arith.constant 5.000000e-01 : f32
    %86 = vector.broadcast %cst_23 : f32 to vector<1x256xf32>
    %87 = arith.cmpf ogt, %81, %86 : vector<1x256xf32>
    %cst_24 = arith.constant 1.500000e+00 : f32
    %88 = vector.broadcast %cst_24 : f32 to vector<1x256xf32>
    %89 = arith.cmpf olt, %81, %88 : vector<1x256xf32>
    %90 = arith.andi %87, %89 : vector<1x256xi1>
    %91 = arith.extui %90 : vector<1x256xi1> to vector<1x256xi32>
    %92 = arith.sitofp %91 : vector<1x256xi32> to vector<1x256xf32>
    %cst_25 = arith.constant 5.000000e-01 : f32
    %93 = vector.broadcast %cst_25 : f32 to vector<1x256xf32>
    %94 = arith.cmpf olt, %81, %93 : vector<1x256xf32>
    %95 = arith.extui %94 : vector<1x256xi1> to vector<1x256xi32>
    %96 = arith.sitofp %95 : vector<1x256xi32> to vector<1x256xf32>
    %97 = arith.mulf %96, %26 : vector<1x256xf32>
    %98 = vector.extract_strided_slice %8 {offsets = [5, 0], sizes = [1, 256], strides = [1, 1]} : vector<9x256xf32> to vector<1x256xf32>
    %99 = vector.extract_strided_slice %8 {offsets = [8, 0], sizes = [1, 256], strides = [1, 1]} : vector<9x256xf32> to vector<1x256xf32>
    %100 = vector.extract_strided_slice %32 {offsets = [3, 0], sizes = [1, 256], strides = [1, 1]} : vector<9x256xf32> to vector<1x256xf32>
    %101 = vector.extract_strided_slice %32 {offsets = [4, 0], sizes = [1, 256], strides = [1, 1]} : vector<9x256xf32> to vector<1x256xf32>
    %102 = arith.addf %100, %101 : vector<1x256xf32>
    %103 = vector.extract_strided_slice %32 {offsets = [5, 0], sizes = [1, 256], strides = [1, 1]} : vector<9x256xf32> to vector<1x256xf32>
    %104 = arith.addf %102, %103 : vector<1x256xf32>
    %105 = vector.extract_strided_slice %32 {offsets = [6, 0], sizes = [1, 256], strides = [1, 1]} : vector<9x256xf32> to vector<1x256xf32>
    %106 = vector.extract_strided_slice %32 {offsets = [7, 0], sizes = [1, 256], strides = [1, 1]} : vector<9x256xf32> to vector<1x256xf32>
    %107 = arith.addf %105, %106 : vector<1x256xf32>
    %108 = vector.extract_strided_slice %32 {offsets = [8, 0], sizes = [1, 256], strides = [1, 1]} : vector<9x256xf32> to vector<1x256xf32>
    %109 = arith.addf %107, %108 : vector<1x256xf32>
    %110 = vector.extract_strided_slice %34 {offsets = [3, 0], sizes = [1, 256], strides = [1, 1]} : vector<9x256xf32> to vector<1x256xf32>
    %111 = vector.extract_strided_slice %34 {offsets = [4, 0], sizes = [1, 256], strides = [1, 1]} : vector<9x256xf32> to vector<1x256xf32>
    %112 = arith.addf %110, %111 : vector<1x256xf32>
    %113 = vector.extract_strided_slice %34 {offsets = [5, 0], sizes = [1, 256], strides = [1, 1]} : vector<9x256xf32> to vector<1x256xf32>
    %114 = arith.addf %112, %113 : vector<1x256xf32>
    %115 = vector.extract_strided_slice %34 {offsets = [6, 0], sizes = [1, 256], strides = [1, 1]} : vector<9x256xf32> to vector<1x256xf32>
    %116 = vector.extract_strided_slice %34 {offsets = [7, 0], sizes = [1, 256], strides = [1, 1]} : vector<9x256xf32> to vector<1x256xf32>
    %117 = arith.addf %115, %116 : vector<1x256xf32>
    %118 = vector.extract_strided_slice %34 {offsets = [8, 0], sizes = [1, 256], strides = [1, 1]} : vector<9x256xf32> to vector<1x256xf32>
    %119 = arith.addf %117, %118 : vector<1x256xf32>
    %120 = vector.extract_strided_slice %32 {offsets = [3, 0], sizes = [1, 256], strides = [1, 1]} : vector<9x256xf32> to vector<1x256xf32>
    %121 = arith.mulf %120, %120 : vector<1x256xf32>
    %122 = vector.extract_strided_slice %32 {offsets = [4, 0], sizes = [1, 256], strides = [1, 1]} : vector<9x256xf32> to vector<1x256xf32>
    %123 = arith.mulf %122, %122 : vector<1x256xf32>
    %124 = arith.addf %121, %123 : vector<1x256xf32>
    %125 = vector.extract_strided_slice %32 {offsets = [5, 0], sizes = [1, 256], strides = [1, 1]} : vector<9x256xf32> to vector<1x256xf32>
    %126 = arith.mulf %125, %125 : vector<1x256xf32>
    %127 = arith.addf %124, %126 : vector<1x256xf32>
    %128 = vector.extract_strided_slice %8 {offsets = [3, 0], sizes = [3, 256], strides = [1, 1]} : vector<9x256xf32> to vector<3x256xf32>
    %129 = vector.extract_strided_slice %30 {offsets = [6, 0], sizes = [3, 256], strides = [1, 1]} : vector<9x256xf32> to vector<3x256xf32>
    %130 = arith.subf %128, %129 : vector<3x256xf32>
    %131 = math.absf %130 : vector<3x256xf32>
    %132 = vector.extract_strided_slice %131 {offsets = [0, 0], sizes = [1, 256], strides = [1, 1]} : vector<3x256xf32> to vector<1x256xf32>
    %133 = arith.mulf %132, %132 : vector<1x256xf32>
    %134 = vector.extract_strided_slice %131 {offsets = [1, 0], sizes = [1, 256], strides = [1, 1]} : vector<3x256xf32> to vector<1x256xf32>
    %135 = arith.mulf %134, %134 : vector<1x256xf32>
    %136 = arith.addf %133, %135 : vector<1x256xf32>
    %137 = vector.extract_strided_slice %131 {offsets = [2, 0], sizes = [1, 256], strides = [1, 1]} : vector<3x256xf32> to vector<1x256xf32>
    %138 = arith.mulf %137, %137 : vector<1x256xf32>
    %139 = arith.addf %136, %138 : vector<1x256xf32>
    %140 = vector.extract_strided_slice %131 {offsets = [0, 0], sizes = [1, 256], strides = [1, 1]} : vector<3x256xf32> to vector<1x256xf32>
    %141 = vector.extract_strided_slice %131 {offsets = [1, 0], sizes = [1, 256], strides = [1, 1]} : vector<3x256xf32> to vector<1x256xf32>
    %142 = arith.addf %140, %141 : vector<1x256xf32>
    %143 = vector.extract_strided_slice %131 {offsets = [2, 0], sizes = [1, 256], strides = [1, 1]} : vector<3x256xf32> to vector<1x256xf32>
    %144 = arith.addf %142, %143 : vector<1x256xf32>
    %145 = vector.extract_strided_slice %12 {offsets = [3, 0], sizes = [3, 256], strides = [1, 1]} : vector<9x256xf32> to vector<3x256xf32>
    %146 = vector.extract_strided_slice %14 {offsets = [6, 0], sizes = [3, 256], strides = [1, 1]} : vector<9x256xf32> to vector<3x256xf32>
    %147 = arith.subf %145, %146 : vector<3x256xf32>
    %148 = vector.extract_strided_slice %147 {offsets = [0, 0], sizes = [1, 256], strides = [1, 1]} : vector<3x256xf32> to vector<1x256xf32>
    %149 = arith.mulf %148, %148 : vector<1x256xf32>
    %150 = vector.extract_strided_slice %147 {offsets = [1, 0], sizes = [1, 256], strides = [1, 1]} : vector<3x256xf32> to vector<1x256xf32>
    %151 = arith.mulf %150, %150 : vector<1x256xf32>
    %152 = arith.addf %149, %151 : vector<1x256xf32>
    %153 = vector.extract_strided_slice %147 {offsets = [2, 0], sizes = [1, 256], strides = [1, 1]} : vector<3x256xf32> to vector<1x256xf32>
    %154 = arith.mulf %153, %153 : vector<1x256xf32>
    %155 = arith.addf %152, %154 : vector<1x256xf32>
    %156 = arith.cmpf olt, %139, %127 : vector<1x256xf32>
    %cst_26 = arith.constant 1.000000e+00 : f32
    %157 = vector.broadcast %cst_26 : f32 to vector<1x256xf32>
    %158 = arith.cmpf oge, %81, %157 : vector<1x256xf32>
    %159 = arith.andi %156, %158 : vector<1x256xi1>
    %160 = vector.extract_strided_slice %49 {offsets = [1, 0], sizes = [1, 256], strides = [1, 1]} : vector<3x256xf32> to vector<1x256xf32>
    %161 = vector.extract_strided_slice %18 {offsets = [1, 0], sizes = [1, 256], strides = [1, 1]} : vector<3x256xf32> to vector<1x256xf32>
    %162 = arith.mulf %161, %79 : vector<1x256xf32>
    %163 = arith.subf %160, %162 : vector<1x256xf32>
    %164 = vector.extract_strided_slice %47 {offsets = [1, 0], sizes = [1, 256], strides = [1, 1]} : vector<3x256xf32> to vector<1x256xf32>
    %165 = arith.addf %163, %164 : vector<1x256xf32>
    %166 = vector.extract_strided_slice %49 {offsets = [1, 0], sizes = [1, 256], strides = [1, 1]} : vector<3x256xf32> to vector<1x256xf32>
    %167 = vector.extract_strided_slice %18 {offsets = [1, 0], sizes = [1, 256], strides = [1, 1]} : vector<3x256xf32> to vector<1x256xf32>
    %168 = arith.mulf %167, %80 : vector<1x256xf32>
    %169 = arith.subf %166, %168 : vector<1x256xf32>
    %170 = vector.extract_strided_slice %47 {offsets = [1, 0], sizes = [1, 256], strides = [1, 1]} : vector<3x256xf32> to vector<1x256xf32>
    %171 = arith.addf %169, %170 : vector<1x256xf32>
    %172 = vector.extract_strided_slice %49 {offsets = [2, 0], sizes = [1, 256], strides = [1, 1]} : vector<3x256xf32> to vector<1x256xf32>
    %173 = vector.extract_strided_slice %18 {offsets = [2, 0], sizes = [1, 256], strides = [1, 1]} : vector<3x256xf32> to vector<1x256xf32>
    %174 = arith.mulf %173, %80 : vector<1x256xf32>
    %175 = arith.subf %172, %174 : vector<1x256xf32>
    %176 = vector.extract_strided_slice %47 {offsets = [2, 0], sizes = [1, 256], strides = [1, 1]} : vector<3x256xf32> to vector<1x256xf32>
    %177 = arith.addf %175, %176 : vector<1x256xf32>
    %178 = vector.extract_strided_slice %49 {offsets = [2, 0], sizes = [1, 256], strides = [1, 1]} : vector<3x256xf32> to vector<1x256xf32>
    %179 = vector.extract_strided_slice %18 {offsets = [2, 0], sizes = [1, 256], strides = [1, 1]} : vector<3x256xf32> to vector<1x256xf32>
    %180 = arith.mulf %179, %79 : vector<1x256xf32>
    %181 = arith.subf %178, %180 : vector<1x256xf32>
    %182 = vector.extract_strided_slice %47 {offsets = [2, 0], sizes = [1, 256], strides = [1, 1]} : vector<3x256xf32> to vector<1x256xf32>
    %183 = arith.addf %181, %182 : vector<1x256xf32>
    %cst_27 = arith.constant 0.000000e+00 : f32
    %184 = vector.broadcast %cst_27 : f32 to vector<1x256xf32>
    %185 = arith.cmpf ogt, %85, %184 : vector<1x256xf32>
    %cst_28 = arith.constant 1.000000e+00 : f32
    %186 = vector.broadcast %cst_28 : f32 to vector<1x256xf32>
    %187 = arith.select %185, %98, %186 : vector<1x256xi1>, vector<1x256xf32>
    %cst_29 = arith.constant 0.000000e+00 : f32
    %188 = vector.broadcast %cst_29 : f32 to vector<1x256xf32>
    %189 = arith.cmpf ogt, %85, %188 : vector<1x256xf32>
    %cst_30 = arith.constant 1.000000e+00 : f32
    %190 = vector.broadcast %cst_30 : f32 to vector<1x256xf32>
    %191 = arith.select %189, %99, %190 : vector<1x256xi1>, vector<1x256xf32>
    %192 = arith.divf %104, %187 : vector<1x256xf32>
    %193 = arith.divf %109, %191 : vector<1x256xf32>
    %194 = arith.addf %192, %193 : vector<1x256xf32>
    %195 = arith.mulf %85, %194 : vector<1x256xf32>
    %196 = arith.addf %114, %119 : vector<1x256xf32>
    %197 = arith.mulf %85, %196 : vector<1x256xf32>
    %198 = arith.addf %165, %177 : vector<1x256xf32>
    %199 = arith.mulf %85, %198 : vector<1x256xf32>
    %cst_31 = arith.constant 0.000000e+00 : f32
    %200 = vector.broadcast %cst_31 : f32 to vector<1x256xf32>
    %201 = arith.cmpf ogt, %92, %200 : vector<1x256xf32>
    %cst_32 = arith.constant 1.000000e+00 : f32
    %202 = vector.broadcast %cst_32 : f32 to vector<1x256xf32>
    %203 = arith.select %201, %98, %202 : vector<1x256xi1>, vector<1x256xf32>
    %204 = arith.select %159, %144, %104 : vector<1x256xi1>, vector<1x256xf32>
    %205 = arith.mulf %92, %204 : vector<1x256xf32>
    %206 = arith.divf %205, %203 : vector<1x256xf32>
    %207 = arith.select %159, %155, %114 : vector<1x256xi1>, vector<1x256xf32>
    %208 = arith.mulf %92, %207 : vector<1x256xf32>
    %209 = arith.select %159, %183, %165 : vector<1x256xi1>, vector<1x256xf32>
    %210 = arith.addf %209, %171 : vector<1x256xf32>
    %211 = arith.mulf %92, %210 : vector<1x256xf32>
    %212 = arith.addf %165, %171 : vector<1x256xf32>
    %213 = arith.mulf %97, %212 : vector<1x256xf32>
    %c0_33 = arith.constant 0 : index
    %c0_34 = arith.constant 0 : index
    %c0_35 = arith.constant 0 : index
    %214 = vector.load %arg4[%c0_33, %c0_34, %c0_35] : memref<1x16x256xf32, #tpu.memory_space<vmem>>, vector<1x1x256xf32>
    %215 = vector.shape_cast %214 : vector<1x1x256xf32> to vector<1x256xf32>
    %216 = arith.addf %215, %68 : vector<1x256xf32>
    %c0_36 = arith.constant 0 : index
    %c0_37 = arith.constant 0 : index
    %c0_38 = arith.constant 0 : index
    %217 = vector.load %arg4[%c0_36, %c0_37, %c0_38] : memref<1x16x256xf32, #tpu.memory_space<vmem>>, vector<1x1x256xf32>
    %218 = vector.shape_cast %217 : vector<1x1x256xf32> to vector<1x256xf32>
    %219 = vector.shape_cast %216 : vector<1x256xf32> to vector<1x1x256xf32>
    tpu.vector_store %arg4[%c0_36, %c0_37, %c0_38], %219 {strides = array<i32>} : memref<1x16x256xf32, #tpu.memory_space<vmem>>, vector<1x1x256xf32>,
    %c0_39 = arith.constant 0 : index
    %c1 = arith.constant 1 : index
    %c0_40 = arith.constant 0 : index
    %220 = vector.load %arg4[%c0_39, %c1, %c0_40] : memref<1x16x256xf32, #tpu.memory_space<vmem>>, vector<1x1x256xf32>
    %221 = vector.shape_cast %220 : vector<1x1x256xf32> to vector<1x256xf32>
    %222 = arith.addf %221, %50 : vector<1x256xf32>
    %c0_41 = arith.constant 0 : index
    %c1_42 = arith.constant 1 : index
    %c0_43 = arith.constant 0 : index
    %223 = vector.load %arg4[%c0_41, %c1_42, %c0_43] : memref<1x16x256xf32, #tpu.memory_space<vmem>>, vector<1x1x256xf32>
    %224 = vector.shape_cast %223 : vector<1x1x256xf32> to vector<1x256xf32>
    %225 = vector.shape_cast %222 : vector<1x256xf32> to vector<1x1x256xf32>
    tpu.vector_store %arg4[%c0_41, %c1_42, %c0_43], %225 {strides = array<i32>} : memref<1x16x256xf32, #tpu.memory_space<vmem>>, vector<1x1x256xf32>,
    %c0_44 = arith.constant 0 : index
    %c2 = arith.constant 2 : index
    %c0_45 = arith.constant 0 : index
    %226 = vector.load %arg4[%c0_44, %c2, %c0_45] : memref<1x16x256xf32, #tpu.memory_space<vmem>>, vector<1x1x256xf32>
    %227 = vector.shape_cast %226 : vector<1x1x256xf32> to vector<1x256xf32>
    %228 = arith.addf %227, %69 : vector<1x256xf32>
    %c0_46 = arith.constant 0 : index
    %c2_47 = arith.constant 2 : index
    %c0_48 = arith.constant 0 : index
    %229 = vector.load %arg4[%c0_46, %c2_47, %c0_48] : memref<1x16x256xf32, #tpu.memory_space<vmem>>, vector<1x1x256xf32>
    %230 = vector.shape_cast %229 : vector<1x1x256xf32> to vector<1x256xf32>
    %231 = vector.shape_cast %228 : vector<1x256xf32> to vector<1x1x256xf32>
    tpu.vector_store %arg4[%c0_46, %c2_47, %c0_48], %231 {strides = array<i32>} : memref<1x16x256xf32, #tpu.memory_space<vmem>>, vector<1x1x256xf32>,
    %c0_49 = arith.constant 0 : index
    %c3 = arith.constant 3 : index
    %c0_50 = arith.constant 0 : index
    %232 = vector.load %arg4[%c0_49, %c3, %c0_50] : memref<1x16x256xf32, #tpu.memory_space<vmem>>, vector<1x1x256xf32>
    %233 = vector.shape_cast %232 : vector<1x1x256xf32> to vector<1x256xf32>
    %234 = arith.addf %233, %76 : vector<1x256xf32>
    %c0_51 = arith.constant 0 : index
    %c3_52 = arith.constant 3 : index
    %c0_53 = arith.constant 0 : index
    %235 = vector.load %arg4[%c0_51, %c3_52, %c0_53] : memref<1x16x256xf32, #tpu.memory_space<vmem>>, vector<1x1x256xf32>
    %236 = vector.shape_cast %235 : vector<1x1x256xf32> to vector<1x256xf32>
    %237 = vector.shape_cast %234 : vector<1x256xf32> to vector<1x1x256xf32>
    tpu.vector_store %arg4[%c0_51, %c3_52, %c0_53], %237 {strides = array<i32>} : memref<1x16x256xf32, #tpu.memory_space<vmem>>, vector<1x1x256xf32>,
    %c0_54 = arith.constant 0 : index
    %c4 = arith.constant 4 : index
    %c0_55 = arith.constant 0 : index
    %238 = vector.load %arg4[%c0_54, %c4, %c0_55] : memref<1x16x256xf32, #tpu.memory_space<vmem>>, vector<1x1x256xf32>
    %239 = vector.shape_cast %238 : vector<1x1x256xf32> to vector<1x256xf32>
    %240 = arith.addf %239, %195 : vector<1x256xf32>
    %c0_56 = arith.constant 0 : index
    %c4_57 = arith.constant 4 : index
    %c0_58 = arith.constant 0 : index
    %241 = vector.load %arg4[%c0_56, %c4_57, %c0_58] : memref<1x16x256xf32, #tpu.memory_space<vmem>>, vector<1x1x256xf32>
    %242 = vector.shape_cast %241 : vector<1x1x256xf32> to vector<1x256xf32>
    %243 = vector.shape_cast %240 : vector<1x256xf32> to vector<1x1x256xf32>
    tpu.vector_store %arg4[%c0_56, %c4_57, %c0_58], %243 {strides = array<i32>} : memref<1x16x256xf32, #tpu.memory_space<vmem>>, vector<1x1x256xf32>,
    %c0_59 = arith.constant 0 : index
    %c5 = arith.constant 5 : index
    %c0_60 = arith.constant 0 : index
    %244 = vector.load %arg4[%c0_59, %c5, %c0_60] : memref<1x16x256xf32, #tpu.memory_space<vmem>>, vector<1x1x256xf32>
    %245 = vector.shape_cast %244 : vector<1x1x256xf32> to vector<1x256xf32>
    %246 = arith.addf %245, %85 : vector<1x256xf32>
    %c0_61 = arith.constant 0 : index
    %c5_62 = arith.constant 5 : index
    %c0_63 = arith.constant 0 : index
    %247 = vector.load %arg4[%c0_61, %c5_62, %c0_63] : memref<1x16x256xf32, #tpu.memory_space<vmem>>, vector<1x1x256xf32>
    %248 = vector.shape_cast %247 : vector<1x1x256xf32> to vector<1x256xf32>
    %249 = vector.shape_cast %246 : vector<1x256xf32> to vector<1x1x256xf32>
    tpu.vector_store %arg4[%c0_61, %c5_62, %c0_63], %249 {strides = array<i32>} : memref<1x16x256xf32, #tpu.memory_space<vmem>>, vector<1x1x256xf32>,
    %c0_64 = arith.constant 0 : index
    %c6 = arith.constant 6 : index
    %c0_65 = arith.constant 0 : index
    %250 = vector.load %arg4[%c0_64, %c6, %c0_65] : memref<1x16x256xf32, #tpu.memory_space<vmem>>, vector<1x1x256xf32>
    %251 = vector.shape_cast %250 : vector<1x1x256xf32> to vector<1x256xf32>
    %252 = arith.addf %251, %197 : vector<1x256xf32>
    %c0_66 = arith.constant 0 : index
    %c6_67 = arith.constant 6 : index
    %c0_68 = arith.constant 0 : index
    %253 = vector.load %arg4[%c0_66, %c6_67, %c0_68] : memref<1x16x256xf32, #tpu.memory_space<vmem>>, vector<1x1x256xf32>
    %254 = vector.shape_cast %253 : vector<1x1x256xf32> to vector<1x256xf32>
    %255 = vector.shape_cast %252 : vector<1x256xf32> to vector<1x1x256xf32>
    tpu.vector_store %arg4[%c0_66, %c6_67, %c0_68], %255 {strides = array<i32>} : memref<1x16x256xf32, #tpu.memory_space<vmem>>, vector<1x1x256xf32>,
    %c0_69 = arith.constant 0 : index
    %c7 = arith.constant 7 : index
    %c0_70 = arith.constant 0 : index
    %256 = vector.load %arg4[%c0_69, %c7, %c0_70] : memref<1x16x256xf32, #tpu.memory_space<vmem>>, vector<1x1x256xf32>
    %257 = vector.shape_cast %256 : vector<1x1x256xf32> to vector<1x256xf32>
    %258 = arith.addf %257, %199 : vector<1x256xf32>
    %c0_71 = arith.constant 0 : index
    %c7_72 = arith.constant 7 : index
    %c0_73 = arith.constant 0 : index
    %259 = vector.load %arg4[%c0_71, %c7_72, %c0_73] : memref<1x16x256xf32, #tpu.memory_space<vmem>>, vector<1x1x256xf32>
    %260 = vector.shape_cast %259 : vector<1x1x256xf32> to vector<1x256xf32>
    %261 = vector.shape_cast %258 : vector<1x256xf32> to vector<1x1x256xf32>
    tpu.vector_store %arg4[%c0_71, %c7_72, %c0_73], %261 {strides = array<i32>} : memref<1x16x256xf32, #tpu.memory_space<vmem>>, vector<1x1x256xf32>,
    %c0_74 = arith.constant 0 : index
    %c8 = arith.constant 8 : index
    %c0_75 = arith.constant 0 : index
    %262 = vector.load %arg4[%c0_74, %c8, %c0_75] : memref<1x16x256xf32, #tpu.memory_space<vmem>>, vector<1x1x256xf32>
    %263 = vector.shape_cast %262 : vector<1x1x256xf32> to vector<1x256xf32>
    %264 = arith.addf %263, %206 : vector<1x256xf32>
    %c0_76 = arith.constant 0 : index
    %c8_77 = arith.constant 8 : index
    %c0_78 = arith.constant 0 : index
    %265 = vector.load %arg4[%c0_76, %c8_77, %c0_78] : memref<1x16x256xf32, #tpu.memory_space<vmem>>, vector<1x1x256xf32>
    %266 = vector.shape_cast %265 : vector<1x1x256xf32> to vector<1x256xf32>
    %267 = vector.shape_cast %264 : vector<1x256xf32> to vector<1x1x256xf32>
    tpu.vector_store %arg4[%c0_76, %c8_77, %c0_78], %267 {strides = array<i32>} : memref<1x16x256xf32, #tpu.memory_space<vmem>>, vector<1x1x256xf32>,
    %c0_79 = arith.constant 0 : index
    %c9_80 = arith.constant 9 : index
    %c0_81 = arith.constant 0 : index
    %268 = vector.load %arg4[%c0_79, %c9_80, %c0_81] : memref<1x16x256xf32, #tpu.memory_space<vmem>>, vector<1x1x256xf32>
    %269 = vector.shape_cast %268 : vector<1x1x256xf32> to vector<1x256xf32>
    %270 = arith.addf %269, %92 : vector<1x256xf32>
    %c0_82 = arith.constant 0 : index
    %c9_83 = arith.constant 9 : index
    %c0_84 = arith.constant 0 : index
    %271 = vector.load %arg4[%c0_82, %c9_83, %c0_84] : memref<1x16x256xf32, #tpu.memory_space<vmem>>, vector<1x1x256xf32>
    %272 = vector.shape_cast %271 : vector<1x1x256xf32> to vector<1x256xf32>
    %273 = vector.shape_cast %270 : vector<1x256xf32> to vector<1x1x256xf32>
    tpu.vector_store %arg4[%c0_82, %c9_83, %c0_84], %273 {strides = array<i32>} : memref<1x16x256xf32, #tpu.memory_space<vmem>>, vector<1x1x256xf32>,
    %c0_85 = arith.constant 0 : index
    %c10 = arith.constant 10 : index
    %c0_86 = arith.constant 0 : index
    %274 = vector.load %arg4[%c0_85, %c10, %c0_86] : memref<1x16x256xf32, #tpu.memory_space<vmem>>, vector<1x1x256xf32>
    %275 = vector.shape_cast %274 : vector<1x1x256xf32> to vector<1x256xf32>
    %276 = arith.addf %275, %208 : vector<1x256xf32>
    %c0_87 = arith.constant 0 : index
    %c10_88 = arith.constant 10 : index
    %c0_89 = arith.constant 0 : index
    %277 = vector.load %arg4[%c0_87, %c10_88, %c0_89] : memref<1x16x256xf32, #tpu.memory_space<vmem>>, vector<1x1x256xf32>
    %278 = vector.shape_cast %277 : vector<1x1x256xf32> to vector<1x256xf32>
    %279 = vector.shape_cast %276 : vector<1x256xf32> to vector<1x1x256xf32>
    tpu.vector_store %arg4[%c0_87, %c10_88, %c0_89], %279 {strides = array<i32>} : memref<1x16x256xf32, #tpu.memory_space<vmem>>, vector<1x1x256xf32>,
    %c0_90 = arith.constant 0 : index
    %c11 = arith.constant 11 : index
    %c0_91 = arith.constant 0 : index
    %280 = vector.load %arg4[%c0_90, %c11, %c0_91] : memref<1x16x256xf32, #tpu.memory_space<vmem>>, vector<1x1x256xf32>
    %281 = vector.shape_cast %280 : vector<1x1x256xf32> to vector<1x256xf32>
    %282 = arith.addf %281, %211 : vector<1x256xf32>
    %c0_92 = arith.constant 0 : index
    %c11_93 = arith.constant 11 : index
    %c0_94 = arith.constant 0 : index
    %283 = vector.load %arg4[%c0_92, %c11_93, %c0_94] : memref<1x16x256xf32, #tpu.memory_space<vmem>>, vector<1x1x256xf32>
    %284 = vector.shape_cast %283 : vector<1x1x256xf32> to vector<1x256xf32>
    %285 = vector.shape_cast %282 : vector<1x256xf32> to vector<1x1x256xf32>
    tpu.vector_store %arg4[%c0_92, %c11_93, %c0_94], %285 {strides = array<i32>} : memref<1x16x256xf32, #tpu.memory_space<vmem>>, vector<1x1x256xf32>,
    %c0_95 = arith.constant 0 : index
    %c12 = arith.constant 12 : index
    %c0_96 = arith.constant 0 : index
    %286 = vector.load %arg4[%c0_95, %c12, %c0_96] : memref<1x16x256xf32, #tpu.memory_space<vmem>>, vector<1x1x256xf32>
    %287 = vector.shape_cast %286 : vector<1x1x256xf32> to vector<1x256xf32>
    %288 = arith.addf %287, %213 : vector<1x256xf32>
    %c0_97 = arith.constant 0 : index
    %c12_98 = arith.constant 12 : index
    %c0_99 = arith.constant 0 : index
    %289 = vector.load %arg4[%c0_97, %c12_98, %c0_99] : memref<1x16x256xf32, #tpu.memory_space<vmem>>, vector<1x1x256xf32>
    %290 = vector.shape_cast %289 : vector<1x1x256xf32> to vector<1x256xf32>
    %291 = vector.shape_cast %288 : vector<1x256xf32> to vector<1x1x256xf32>
    tpu.vector_store %arg4[%c0_97, %c12_98, %c0_99], %291 {strides = array<i32>} : memref<1x16x256xf32, #tpu.memory_space<vmem>>, vector<1x1x256xf32>,
    %c0_100 = arith.constant 0 : index
    %c13 = arith.constant 13 : index
    %c0_101 = arith.constant 0 : index
    %292 = vector.load %arg4[%c0_100, %c13, %c0_101] : memref<1x16x256xf32, #tpu.memory_space<vmem>>, vector<1x1x256xf32>
    %293 = vector.shape_cast %292 : vector<1x1x256xf32> to vector<1x256xf32>
    %294 = arith.addf %293, %97 : vector<1x256xf32>
    %c0_102 = arith.constant 0 : index
    %c13_103 = arith.constant 13 : index
    %c0_104 = arith.constant 0 : index
    %295 = vector.load %arg4[%c0_102, %c13_103, %c0_104] : memref<1x16x256xf32, #tpu.memory_space<vmem>>, vector<1x1x256xf32>
    %296 = vector.shape_cast %295 : vector<1x1x256xf32> to vector<1x256xf32>
    %297 = vector.shape_cast %294 : vector<1x256xf32> to vector<1x1x256xf32>
    tpu.vector_store %arg4[%c0_102, %c13_103, %c0_104], %297 {strides = array<i32>} : memref<1x16x256xf32, #tpu.memory_space<vmem>>, vector<1x1x256xf32>,
    return
  }
  func.func @transform_0(%arg0: i32, %arg1: i32) -> (i32, i32, i32) {
    %c0_i32 = arith.constant 0 : i32
    %c0_i32_0 = arith.constant 0 : i32
    %c0_i32_1 = arith.constant 0 : i32
    return %arg0, %c0_i32, %c0_i32_0 : i32, i32, i32
  }
  func.func @transform_1(%arg0: i32, %arg1: i32) -> (i32, i32, i32) {
    %c0_i32 = arith.constant 0 : i32
    %c0_i32_0 = arith.constant 0 : i32
    return %arg0, %c0_i32, %arg1 : i32, i32, i32
  }
  func.func @transform_2(%arg0: i32, %arg1: i32) -> (i32, i32, i32) {
    %c0_i32 = arith.constant 0 : i32
    %c0_i32_0 = arith.constant 0 : i32
    %c0_i32_1 = arith.constant 0 : i32
    return %arg0, %c0_i32, %c0_i32_0 : i32, i32, i32
  }
}

</mosaic_0001>

<bundles_post_ra>
// kernel: tpu_custom_call.1
= control target key start
LH: loop header
LB: loop body
LE: loop exit
PB: predicated region body
PF: predicated region fallthrough
CT: control target
= control target key end

     0   :  { %7 = vsyncpa [#allocation3], 0  ;;  %s2029_s0 = inlined_call_operand.vmem [shape: f32[2,32,1], index: 0, kind: input, shape index: {}]   ;;  %s2030_s1 = inlined_call_operand.hbm [shape: f32[2,48,256], index: 1, kind: input, shape index: {}]   ;;  %s2031_s2 = inlined_call_operand.hbm [shape: f32[2,16,256], index: 2, kind: output, shape index: {}]  }
   0x1   :  { %9 = vsyncpa [#allocation3 + $0x1], 0 }
   0x2   :  { %10 = vsyncpa [#allocation4], 0 }
   0x3   :  { %12 = vsyncpa [#allocation4 + $0x1], 0  ;;  %s1493_s9 = smov 0   ;;  %s1495_s10 = smov 0  }
   0x4   :  { %s1497_s11 = smov 0   ;;  %s1499_s12 = smov 0  }
   0x5   :  { %s1501_s13 = smov 0   ;;  %s1503_s14 = smov 0  }
   0x6 LB: > { %s1203_s15 = sadd.s32 4294967295, %s1467_s14   ;;  %s1204_s16 = sadd.s32 4294967294, %s1467_s14   ;;  %s1467_s14 = sphi %s1503_s14, %s18_s14   ;;  %s1463_s13 = sphi %s1501_s13, %s2048_s13   ;;  %s1459_s12 = sphi %s1499_s12, %s2047_s12   ;;  %s1455_s11 = sphi %s1497_s11, %s2046_s11   ;;  %s1451_s10 = sphi %s1495_s10, %s2045_s10   ;;  %s1447_s9 = sphi %s1493_s9, %s2044_s9  }
   0x7   : > { %s30_s17 = sadd.s32 1, %s1463_s13  ;;  %s65_s18 = sadd.s32 1, %s1455_s11 }
   0x8   : > { %p32_p0 = scmp.ge.s32.totalorder %s30_s17, 2  ;;  %p72_p1 = scmp.ne.s32.totalorder %s1455_s11, %s1451_s10 }
   0x9   : > { %p73_p2 = scmp.eq.s32.totalorder %s1467_s14, 0  ;;  %p78_p3 = scmp.ne.s32.totalorder %s1451_s10, %s1447_s9 }
   0xa   : > { %s2050_s17 = smov (%p32_p0, %s30_s17), 0  ;;  %p79_p5 = scmp.eq.s32.totalorder %s1203_s15, 0 }
   0xb   : > { %p1534_p4 = por %p73_p2, %p72_p1  ;;  %s60_s20 = ssub.s32 %s1463_s13, %s2050_s17 }
   0xc   : > { %p102_p6 = scmp.eq.s32.totalorder %s1203_s15, 1  ;;  %p63_p7 = scmp.eq.s32.totalorder %s60_s20, 0 }
   0xd   : > { %p1540_p8 = por %p79_p5, %p78_p3  ;;  %p108_p10 = scmp.eq.s32.totalorder %s1204_s16, 1 }
   0xe   : > { %p1544_p9 = por %p102_p6, %p72_p1  ;;  %p1268_p13 = scmp.lt.s32.totalorder %s1467_s14, 2 }
   0xf   : > { %s1549_s23 = scalar_select %p63_p7, %s1455_s11, %s65_s18  }
  0x10   : > { %p1551_p11 = por %p108_p10, %p78_p3  ;;  %s136_s25 = sand.u32 1, %s1455_s11  }
  0x11   : > { %s1253_s26 = smul.u32 96, %s136_s25  ;;  %p1561_p0 = pnand %p1268_p13, %p1534_p4 }
  0x12   : > { %s1254_s27 = smul.u32 1536, %s1463_s13  ;;  %p1208_p1 = scmp.ge.s32.totalorder %s1467_s14, 1 }
  0x13   : > { %s140_s4 = scalar_lea.vmem [#allocation2], %s1253_s26  ;;  %s137_s6 = scalar_lea.sflag [#allocation3], %s136_s25 }
  0x14   : > { %s148_s3 = scalar_lea.hbm %s2030_s1, %s1254_s27  ;;  %s149_s5 = sshll.u32 %s140_s4, 4  ;;  %s150_s5 = int_to_ptr.vmem [resolvable:$true] %s149_s5 }
  0x15   : > { %p1361_p2 = pneg %p1561_p0  ;;  %s1372_s7 = scalar_lea.vmem %s150_s5, 1536 }
  0x16   : > { %p1373_p3 = scmp.ne.s32.totalorder %s150_s5, %s1372_s7  ;;  %s1469_s8 = smov [#allocation2]  }
  0x17   : > { %s1377_s15 = sshll.u32 %s1469_s8, 4  ;;  %s1378_s15 = int_to_ptr.vmem [resolvable:$false] %s1377_s15 }
  0x18   : > { %p1375_p5 = pnand %p1373_p3, %p1361_p2  ;;  %s1379_s16 = scalar_lea.vmem %s1378_s15, 3072 }
  0x19   : > { %p1380_p4 = scmp.lt.s32.totalorder %s150_s5, %s1378_s15  ;;  %p1381_p7 = scmp.lt.s32.totalorder %s1379_s16, %s1372_s7 }
  0x1a   : > { %p1376_p6 = pneg %p1375_p5 }
  0x1b   : > { %p1382_p10 = por %p1381_p7, %p1380_p4 }
  0x1d   : > { %p1383_p13 = pnand %p1382_p10, %p1376_p6 }
  0x1f   : > { %1386 = shalt.err (!%p1383_p13)
}
  0x20   : > { %s1470_s18 = smov 256   ;;  %s1471_s19 = smov 16  }
  0x21   : > { %1263 = dma.hbm_to_vmem [thread:$0]  (!%p1561_p0), %s148_s3, 1536, %s150_s5, %s137_s6, %s1470_s18, %s1470_s18, %s1471_s19  }
  0x22   : > { %p157_p12 = scmp.lt.s32.totalorder %s1467_s14, 3 }
  0x24   : > { %p158_p2 = pnand %p1208_p1, %p157_p12 }
  0x25   : > { %s1577_s20 = sand.u32 (!%p158_p2), 1, %s1451_s10  }
  0x26   : > { %161 = sbr.rel (%p158_p2) target bundleno = 236 (0xec), region = 28  ;;  %s164_s26 = scalar_lea.sflag (!%p158_p2), [#allocation3], %s1577_s20 }
  0x27   : > { %s1255_s25 = smul.u32 (!%p158_p2), 96, %s1577_s20 }
  0x29   : > { %s1581_s27 = scalar_lea.vmem (!%p158_p2), [#allocation2], %s1255_s25 }
  0x2b   : > { %1438 = dma.done.wait (%p1540_p8), %s164_s26, 1536  }
  0x2c   : > { %1440 = vsyncadd (%p1540_p8), %s164_s26, 4294965760  ;;  %p193_p12 = scmp.lt.s32.totalorder %s1459_s12, 1  ;;  %v1472_v0 = vmov 0   ;;  %s1209_s29 = sshll.u32 %s1577_s20, 5  ;;  %v1473_v1 = vmov 0.0   ;;  %v765_v20 = vlaneseq  ;;  %vm260_vm4 = vcmask 1046528  }
  0x2d   : > { %1326 = vset.pattern.permute.xlu1 %v1472_v0  ;;  %1325 = vset.pattern.permute.xlu0 %v1472_v0  ;;  %s1593_s6 = scalar_lea.vmem [#allocation5], %s1209_s29  ;;  %v227_v2 = vld [vmem:[%s1581_s27 + $0x40] sm:$0x70]  ;;  %v228_v3 = vld [vmem:[%s1581_s27 + $0x48] sm:$0x70]  ;;  %s1252_s21 = sshll.u32 %s1459_s12, 9 }
  0x2e   : > { %s194_s28 = scalar_select %p193_p12, %s1459_s12, 1  ;;  %203 = vst [vmem:[%s1593_s6] sm:$0xff] %v1473_v1  ;;  %204 = vst [vmem:[%s1593_s6 + $0x8] sm:$0xff] %v1473_v1  ;;  %vm319_vm0 = vcmp.gt.f32.partialorder %v227_v2, 0.9  ;;  %vm320_vm1 = vcmp.gt.f32.partialorder %v228_v3, 0.9 }
  0x2f   : > { %205 = vst [vmem:[%s1593_s6 + $0x10] sm:$0xff] %v1473_v1  ;;  %206 = vst [vmem:[%s1593_s6 + $0x18] sm:$0xff] %v1473_v1  ;;  %v1606_v6 = vsel %vm319_vm0, 1.0, %v1473_v1  ;;  %v1609_v7 = vsel %vm320_vm1, 1.0, %v1473_v1  ;;  %v223_v14 = vld [vmem:[%s1581_s27 + $0x30] sm:$0xf8]  ;;  %s1973_s16 = scalar_lea.hbm %s2031_s2, %s1252_s21 }
  0x30   : > { %s1251_s30 = sshll.u32 %s194_s28, 5  ;;  %v433_v9 = vrot.slane %v1606_v6, 1  ;;  %v434_v10 = vrot.slane %v1609_v7, 1  ;;  %v224_v15 = vld [vmem:[%s1581_s27 + $0x38] sm:$0xf8]  ;;  %v301_v24 = vrot.slane %v223_v14, 1  ;;  %v786_v36 = vcombine.high %v1606_v6, %v1609_v7 }
  0x31   : > { %s197_s5 = scalar_lea.vmem %s2029_s0, %s1251_s30  ;;  %v225_v16 = vld [vmem:[%s1581_s27 + $0x40] sm:$0xf]  ;;  %v226_v17 = vld [vmem:[%s1581_s27 + $0x48] sm:$0xf]  ;;  %v1474_v18 = vmov 1966171168  }
  0x32   : > { %v209_v4 = vld [vmem:[%s197_s5 + $0x10] sm:$0xff]  ;;  %v207_v5 = vld [vmem:[%s197_s5] sm:$0xff]  ;;  %v210_v8 = vld [vmem:[%s197_s5 + $0x18] sm:$0xff]  ;;  %v1614_v12 = vadd.f32 %v1606_v6, %v433_v9  ;;  %v1617_v13 = vadd.f32 %v1609_v7, %v434_v10  ;;  %v763_v19 = vunpack.c.l.s4 %v1474_v18  ;;  %v302_v26 = vrot.slane %v225_v16, 1  ;;  %s1107_s7 = sshll.u32 %s1593_s6, 4  ;;  %s1094_s12 = scalar_lea.sflag [#allocation4], %s1577_s20  ;;  %s1975_s7 = int_to_ptr.vmem [resolvable:$true] %s1107_s7 }
  0x33   : > { %277 = vperm.xlu1 %1326, %v209_v4   ;;  %248 = vperm.xlu0 %1325, %v207_v5   ;;  %v208_v11 = vld [vmem:[%s197_s5 + $0x8] sm:$0xff]  ;;  %v219_v23 = vld [vmem:[%s1581_s27 + $0x20] sm:$0xfc]  ;;  %v304_v27 = vrot.slane %v224_v15, 1  ;;  %v305_v28 = vrot.slane %v226_v17, 1  ;;  %v766_v30 = vshrl.u32 %v765_v20, 7 }
  0x34   : > { %vm572_vm2 = vcmp.ge.f32.partialorder %v1614_v12, 1.0  ;;  %vm573_vm3 = vcmp.ge.f32.partialorder %v1617_v13, 1.0  ;;  %v220_v25 = vld [vmem:[%s1581_s27 + $0x28] sm:$0xfc]  ;;  %v764_v29 = vunpack.c.0.s8 %v763_v19  ;;  %v221_v31 = vld [vmem:[%s1581_s27 + $0x30] sm:$0x7]  ;;  %v303_v32 = vsel %vm260_vm4, %v301_v24, %v302_v26 }
  0x35   : > { %v1625_v21 = vsel %vm572_vm2, 1, %v1472_v0  ;;  %v1627_v22 = vsel %vm573_vm3, 1, %v1472_v0  ;;  %v306_v33 = vsel %vm260_vm4, %v304_v27, %v305_v28  ;;  %v311_v34 = vsub.f32 %v219_v23, %v303_v32  ;;  %v222_v37 = vld [vmem:[%s1581_s27 + $0x38] sm:$0x7]  ;;  %v1658_v0 = vld [vmem:[%s1581_s27 + $0x40] sm:$0x80] }
  0x36   : > { %v312_v35 = vsub.f32 %v220_v25, %v306_v33  ;;  %v313_v38 = vsub.f32 %v221_v31, %v302_v26  ;;  %v1637_v41 = vsub.s32 %v764_v29, %v766_v30  ;;  %v314_v46 = vsub.f32 %v222_v37, %v305_v28  ;;  %v1220_v3 = vld [vmem:[%s1593_s6 + $0x1] ss:$8 sm:$0x3]  ;;  %v1662_v4 = vld [vmem:[%s1581_s27 + $0x48] sm:$0x80]  ;;  %s1387_s18 = scalar_lea.vmem %s1975_s7, 512 }
  0x37   : > { %282 = vperm.xlu1 %1326, %v210_v8   ;;  %253 = vperm.xlu0 %1325, %v208_v11   ;;  %v315_v39 = vmul.f32 %v311_v34, %v311_v34  ;;  %vm445_vm5 = vcmp.gt.f32.partialorder %v1614_v12, 0.5  ;;  %vm446_vm6 = vcmp.gt.f32.partialorder %v1617_v13, 0.5  ;;  %vm447_vm7 = vcmp.lt.f32.partialorder %v1614_v12, 1.5  ;;  %v1671_v9 = vld [vmem:[%s1581_s27 + $0x50] sm:$0x3]  ;;  %p1388_p8 = scmp.ne.s32.totalorder %s1975_s7, %s1387_s18  ;;  %s1475_s19 = smov [#allocation5]  }
  0x38   : > { %v316_v40 = vmul.f32 %v312_v35, %v312_v35  ;;  %v793_v47 = vrot.slane %v786_v36, %v1637_v41  ;;  %v317_v48 = vmul.f32 %v313_v38, %v313_v38  ;;  %v548_v51 = vrot.slane %v225_v16, 4  ;;  %vm449_vm9 = vmand %vm445_vm5, %vm447_vm7  ;;  %v1680_v16 = vld [vmem:[%s1581_s27 + $0x58] sm:$0x3]  ;;  %v1222_v26 = vld [vmem:[%s1593_s6 + $0x2] ss:$8 sm:$0x3] }
  0x39   : > { %v375_v42 = vrot.slane %v315_v39, 1  ;;  %v381_v44 = vrot.slane %v315_v39, 2  ;;  %vm448_vm8 = vcmp.lt.f32.partialorder %v1617_v13, 1.5  ;;  %v549_v54 = vrot.slane %v226_v17, 4  ;;  %p1389_p0 = pnand %p1388_p8, %p1544_p9  ;;  %s1391_s25 = sshll.u32 %s1475_s19, 4  ;;  %s1392_s25 = int_to_ptr.vmem [resolvable:$false] %s1391_s25 }
  0x3a   : > { %v376_v43 = vrot.slane %v316_v40, 1  ;;  %v382_v45 = vrot.slane %v316_v40, 2  ;;  %v318_v55 = vmul.f32 %v314_v46, %v314_v46  ;;  %v1648_v56 = vsub.f32 %v219_v23, %v548_v51  ;;  %vm450_vm10 = vmand %vm446_vm6, %vm448_vm8  ;;  %v1236_v34 = vld [vmem:[%s1593_s6 + $0x11] ss:$8 sm:$0x3]  ;;  %s1393_s26 = scalar_lea.vmem %s1392_s25, 1024  ;;  %p1394_p3 = scmp.lt.s32.totalorder %s1975_s7, %s1392_s25 }
  0x3b   : > { %v379_v49 = vadd.f32 %v375_v42, %v315_v39  ;;  %v1652_v59 = vsub.f32 %v220_v25, %v549_v54  ;;  %v800_v60 = vrot.slane %v793_v47, %v1637_v41  ;;  %v473_v63 = vrot.slane %v317_v48, 1  ;;  %p1390_p1 = pneg %p1389_p0  ;;  %p1395_p5 = scmp.lt.s32.totalorder %s1393_s26, %s1387_s18 }
  0x3c   : > { %v380_v50 = vadd.f32 %v376_v43, %v316_v40  ;;  %v474_v2 = vrot.slane %v318_v55, 1  ;;  %v1665_v5 = vsel %vm449_vm9, 1.0, %v1473_v1  ;;  %v1668_v8 = vsel %vm450_vm10, 1.0, %v1473_v1 }
  0x3d   : > { %v1643_v52 = vadd.f32 %v381_v44, %v379_v49  ;;  %v479_v10 = vrot.slane %v317_v48, 2  ;;  %vm1673_vm11 = vcmp.lt.s32.totalorder %v765_v20, 256  ;;  %v977_v15 = vcombine.high %v1665_v5, %v1668_v8  ;;  %p1396_p6 = por %p1395_p5, %p1394_p3 }
  0x3e   : > { %v1645_v53 = vadd.f32 %v382_v45, %v380_v50  ;;  %v477_v17 = vadd.f32 %v473_v63, %v317_v48  ;;  %v802_v18 = vadd.f32 %v1220_v3, %v800_v60  ;;  %v327_v19 = vand.u32 2147483647, %v1658_v0 }
  0x3f   : > { %v411_v57 = vrot.slane %v1643_v52, 6  ;;  %v328_v23 = vand.u32 2147483647, %v1662_v4  ;;  %v478_v24 = vadd.f32 %v474_v2, %v318_v55  ;;  %v984_v20 = vrot.slane %v977_v15, %v1637_v41  ;;  %p1397_p4 = pnand %p1396_p6, %p1390_p1 }
  0x40   : > { %v412_v58 = vrot.slane %v1645_v53, 6  ;;  %v329_v27 = vand.u32 2147483647, %v1671_v9  ;;  %v480_v28 = vrot.slane %v318_v55, 2  ;;  %v330_v29 = vand.u32 2147483647, %v1680_v16 }
  0x41   : > { %v415_v61 = vmul.f32 %v1606_v6, %v411_v57  ;;  %1221 = vst.msk [vmem:[%s1593_s6 + $0x1] ss:$8 sm:$0x3] %vm1673_vm11, %v802_v18  ;;  %v331_v30 = vsub.f32 0.0, %v327_v19  ;;  %v332_v31 = vsub.f32 0.0, %v328_v23  ;;  %v985_v33 = vcombine.high %v984_v20, %v984_v20 }
  0x42   : > { %v416_v62 = vmul.f32 %v1609_v7, %v412_v58  ;;  %v333_v35 = vsub.f32 0.0, %v329_v27  ;;  %v334_v36 = vsub.f32 0.0, %v330_v29  ;;  %v483_v43 = vadd.f32 %v479_v10, %v477_v17 }
  0x43   : > { %v335_v37 = vmul.f32 1.442695, %v331_v30  ;;  %v337_v38 = vmul.f32 1.442695, %v332_v31  ;;  %v992_v39 = vrot.slane %v985_v33, %v1637_v41  ;;  %v484_v44 = vadd.f32 %v480_v28, %v478_v24 }
  0x44   : > { %v809_v14 = vcombine.high %v415_v61, %v416_v62  ;;  %v339_v42 = vmul.f32 1.442695, %v333_v35  ;;  %v341_v45 = vmul.f32 1.442695, %v334_v36  ;;  %v658_v47 = vrot.slane %v483_v43, 3 }
  0x45   : > { %1327 = vpow2.f32 %v335_v37  ;;  %v994_v46 = vadd.f32 %v1236_v34, %v992_v39  ;;  %v659_v48 = vrot.slane %v484_v44, 3  ;;  %v1702_v49 = vmax.f32 %v1671_v9, 0.0  ;;  %v1228_v33 = vld [vmem:[%s1593_s6 + $0x5] ss:$8 sm:$0x3] }
  0x46   : > { %v816_v25 = vrot.slane %v809_v14, %v1637_v41  ;;  %1329 = vpow2.f32 %v337_v38  ;;  %v1705_v50 = vmax.f32 %v1680_v16, 0.0  ;;  %v598_v51 = vrot.slane %v1606_v6, 4  ;;  %v1230_v35 = vld [vmem:[%s1593_s6 + $0x6] ss:$8 sm:$0x3] }
  0x47   : > { %1331 = vpow2.f32 %v339_v42  ;;  %1237 = vst.msk [vmem:[%s1593_s6 + $0x11] ss:$8 sm:$0x3] %vm1673_vm11, %v994_v46  ;;  %v599_v54 = vrot.slane %v1609_v7, 4  ;;  %v662_v55 = vadd.f32 %v658_v47, %v1643_v52  ;;  %v663_v57 = vadd.f32 %v659_v48, %v1645_v53 }
  0x48   : > { %v823_v32 = vrot.slane %v816_v25, %v1637_v41  ;;  %1333 = vpow2.f32 %v341_v45  ;;  %vm439_vm12 = vcmp.gt.f32.partialorder %v1614_v12, 1.5  ;;  %vm440_vm13 = vcmp.gt.f32.partialorder %v1617_v13, 1.5  ;;  %v1244_v36 = vld [vmem:[%s1593_s6 + $0x15] ss:$8 sm:$0x3] }
  0x49   : > { %v1714_v58 = vmul.f32 %v598_v51, %v1671_v9  ;;  %v1717_v60 = vmul.f32 %v599_v54, %v1680_v16  ;;  %vm455_vm14 = vcmp.lt.f32.partialorder %v1614_v12, 0.5  ;;  %vm456_vm15 = vcmp.lt.f32.partialorder %v1617_v13, 0.5 }
  0x4a   : > { %v825_v40 = vadd.f32 %v1222_v26, %v823_v32  ;;  %v1722_v61 = vsel %vm439_vm12, 1.0, %v1473_v1  ;;  %v1725_v62 = vsel %vm440_vm13, 1.0, %v1473_v1  ;;  %v1734_v12 = vsel %vm455_vm14, 1.0, %v1473_v1 }
  0x4b   : > { %v604_v63 = vsub.f32 %v1702_v49, %v1714_v58  ;;  %v605_v2 = vsub.f32 %v1705_v50, %v1717_v60  ;;  %v664_v3 = vmul.f32 %v1722_v61, %v662_v55  ;;  %v665_v10 = vmul.f32 %v1725_v62, %v663_v57 }
  0x4c   : > { %1223 = vst.msk [vmem:[%s1593_s6 + $0x2] ss:$8 sm:$0x3] %vm1673_vm11, %v825_v40  ;;  %v1737_v13 = vsel %vm456_vm15, 1.0, %v1473_v1  ;;  %v881_v15 = vcombine.high %v1722_v61, %v1725_v62  ;;  %v419_v40 = vrot.slane %v1606_v6, 5  ;;  %v420_v44 = vrot.slane %v1609_v7, 5 }
  0x4d   : > { %v905_v19 = vcombine.high %v664_v3, %v665_v10  ;;  %v1073_v23 = vcombine.high %v1734_v12, %v1737_v13  ;;  %v355_v45 = vmax.f32 %v1658_v0, 0.0  ;;  %v588_v47 = vrot.slane %v1606_v6, 6 }
  0x4e   : > { %v888_v20 = vrot.slane %v881_v15, %v1637_v41  ;;  %v423_v46 = vmul.f32 %v419_v40, %v1658_v0  ;;  %v589_v48 = vrot.slane %v1609_v7, 6  ;;  %v356_v51 = vmax.f32 %v1662_v4, 0.0 }
  0x4f   : > { %v912_v1 = vrot.slane %v905_v19, %v1637_v41  ;;  %v1080_v28 = vrot.slane %v1073_v23, %v1637_v41  ;;  %v424_v54 = vmul.f32 %v420_v44, %v1662_v4  ;;  %v582_v55 = vmul.f32 %v419_v40, %v1671_v9 }
  0x50   : > { %v889_v30 = vcombine.high %v888_v20, %v888_v20  ;;  %v583_v57 = vmul.f32 %v420_v44, %v1680_v16  ;;  %v425_v3 = vsub.f32 %v355_v45, %v423_v46  ;;  %v592_v0 = vmul.f32 %v588_v47, %v1671_v9  ;;  %v1224_v47 = vld [vmem:[%s1593_s6 + $0x3] ss:$8 sm:$0x3] }
  0x51   : > { %v913_v31 = vcombine.high %v912_v1, %v912_v1  ;;  %v1081_v32 = vcombine.high %v1080_v28, %v1080_v28  ;;  %v593_v10 = vmul.f32 %v589_v48, %v1680_v16  ;;  %v426_v15 = vsub.f32 %v356_v51, %v424_v54 }
  0x52   : > { %v1328_v14 = vpop.eup %1327  ;;  %v896_v34 = vrot.slane %v889_v30, %v1637_v41  ;;  %v584_v19 = vsub.f32 %v1702_v49, %v582_v55  ;;  %vm387_vm0 = vcmp.gt.f32.partialorder %v1606_v6, 0.0  ;;  %vm388_vm1 = vcmp.gt.f32.partialorder %v1609_v7, 0.0 }
  0x53   : > { %v1330_v17 = vpop.eup %1329  ;;  %v343_v18 = vadd.f32 1.0, %v1328_v14  ;;  %v920_v37 = vrot.slane %v913_v31, %v1637_v41  ;;  %v1088_v38 = vrot.slane %v1081_v32, %v1637_v41  ;;  %v595_v1 = vsub.f32 %v1705_v50, %v593_v10 }
  0x54   : > { %v1332_v24 = vpop.eup %1331  ;;  %v344_v25 = vadd.f32 1.0, %v1330_v17  ;;  %v898_v39 = vadd.f32 %v1228_v33, %v896_v34  ;;  %vm608_vm2 = vcmp.gt.f32.partialorder %v1722_v61, 0.0  ;;  %vm682_vm3 = vcmp.gt.f32.partialorder %v1665_v5, 0.0 }
  0x55   : > { %v1334_v26 = vpop.eup %1333  ;;  %v345_v27 = vadd.f32 1.0, %v1332_v24  ;;  %1335 = vlog2.f32 %v343_v18  ;;  %v922_v42 = vadd.f32 %v1230_v35, %v920_v37  ;;  %v1090_v43 = vadd.f32 %v1244_v36, %v1088_v38 }
  0x56   : > { %v346_v29 = vadd.f32 1.0, %v1334_v26  ;;  %1337 = vlog2.f32 %v344_v25  ;;  %1229 = vst.msk [vmem:[%s1593_s6 + $0x5] ss:$8 sm:$0x3] %vm1673_vm11, %v898_v39  ;;  %v585_v25 = vsub.f32 %v1705_v50, %v583_v57  ;;  %vm609_vm5 = vcmp.gt.f32.partialorder %v1725_v62, 0.0 }
  0x57   : > { %1339 = vlog2.f32 %v345_v27  ;;  %1231 = vst.msk [vmem:[%s1593_s6 + $0x6] ss:$8 sm:$0x3] %vm1673_vm11, %v922_v42  ;;  %1245 = vst.msk [vmem:[%s1593_s6 + $0x15] ss:$8 sm:$0x3] %vm1673_vm11, %v1090_v43  ;;  %v594_v27 = vsub.f32 %v1702_v49, %v592_v0 }
  0x58   : > { %1341 = vlog2.f32 %v346_v29  ;;  %v1242_v0 = vld [vmem:[%s1593_s6 + $0x14] ss:$8 sm:$0x3]  ;;  %vm683_vm6 = vcmp.gt.f32.partialorder %v1668_v8, 0.0 }
  0x62   : > { %v1336_v14 = vpop.eup %1335 }
  0x63   : > { %v1338_v17 = vpop.eup %1337  ;;  %v348_v18 = vmul.f32 0.6931472, %v1336_v14  ;;  %v1232_v14 = vld [vmem:[%s1593_s6 + $0x7] ss:$8 sm:$0x3] }
  0x64   : > { %v1340_v23 = vpop.eup %1339  ;;  %v350_v24 = vmul.f32 0.6931472, %v1338_v17 }
  0x65   : > { %v1342_v4 = vpop.eup %1341  ;;  %v352_v20 = vmul.f32 0.6931472, %v1340_v23  ;;  %v427_v26 = vadd.f32 %v425_v3, %v348_v18  ;;  %v1827_v23 = vld [vmem:[%s1581_s27 + $0x10] sm:$0x1] }
  0x66   : > { %v354_v9 = vmul.f32 0.6931472, %v1342_v4  ;;  %v428_v28 = vadd.f32 %v426_v15, %v350_v24  ;;  %v217_v24 = vld [vmem:[%s1581_s27 + $0x20] sm:$0x3] }
  0x67   : > { %v1777_v16 = vadd.f32 %v584_v19, %v352_v20  ;;  %v1782_v29 = vadd.f32 %v604_v63, %v352_v20  ;;  %v1791_v33 = vadd.f32 %v594_v27, %v352_v20  ;;  %v215_v19 = vld [vmem:[%s1581_s27 + $0x10] sm:$0xfe]  ;;  %v1834_v4 = vld [vmem:[%s1581_s27] sm:$0xff]  ;;  %v216_v20 = vld [vmem:[%s1581_s27 + $0x18] sm:$0xfe] }
  0x68   : > { %v1784_v30 = vadd.f32 %v585_v25, %v354_v9  ;;  %v1789_v31 = vadd.f32 %v605_v2, %v354_v9  ;;  %v832_v32 = vcombine.high %v427_v26, %v428_v28  ;;  %v1793_v34 = vadd.f32 %v595_v1, %v354_v9  ;;  %v1831_v25 = vld [vmem:[%s1581_s27 + $0x18] sm:$0x1]  ;;  %v218_v26 = vld [vmem:[%s1581_s27 + $0x28] sm:$0x3] }
  0x69   : > { %v668_v35 = vrot.slane %v1777_v16, 1  ;;  %v748_v58 = vadd.f32 %v1791_v33, %v1777_v16  ;;  %v1839_v27 = vld [vmem:[%s1581_s27 + $0x8] sm:$0xff]  ;;  %v261_v1 = vrot.slane %v215_v19, 1  ;;  %v391_v9 = vrot.slane %v1834_v4, 6 }
  0x6a   : > { %v669_v36 = vrot.slane %v1784_v30, 1  ;;  %v749_v50 = vadd.f32 %v1793_v34, %v1784_v30  ;;  %v839_v60 = vrot.slane %v832_v32, %v1637_v41  ;;  %v614_v28 = vrot.slane %v1827_v23, 3 }
  0x6b   : > { %v672_v49 = vadd.f32 %v668_v35, %v1777_v16  ;;  %v752_v37 = vrot.slane %v748_v58, 3  ;;  %v262_v32 = vrot.slane %v217_v24, 1  ;;  %v392_v35 = vrot.slane %v1839_v27, 6 }
  0x6c   : > { %v673_v63 = vadd.f32 %v669_v36, %v1784_v30  ;;  %v753_v38 = vrot.slane %v749_v50, 3  ;;  %v840_v39 = vcombine.high %v839_v60, %v839_v60  ;;  %v615_v36 = vrot.slane %v1831_v25, 3 }
  0x6d   : > { %v676_v2 = vrot.slane %v672_v49, 3  ;;  %v756_v43 = vmul.f32 %v1734_v12, %v752_v37  ;;  %v264_v49 = vrot.slane %v216_v20, 1  ;;  %v265_v58 = vrot.slane %v218_v26, 1 }
  0x6e   : > { %v677_v40 = vrot.slane %v673_v63, 3  ;;  %v757_v44 = vmul.f32 %v1737_v13, %v753_v38  ;;  %v847_v45 = vrot.slane %v840_v39, %v1637_v41  ;;  %v554_v50 = vmul.f32 %v1648_v56, %v1648_v56 }
  0x6f   : > { %v680_v42 = vmul.f32 %v1722_v61, %v676_v2  ;;  %v395_v60 = vsel %vm387_vm0, %v391_v9, 1.0  ;;  %v618_v63 = vsel %vm608_vm2, %v614_v28, 1.0  ;;  %v396_v2 = vsel %vm388_vm1, %v392_v35, 1.0 }
  0x70   : > { %v681_v46 = vmul.f32 %v1725_v62, %v677_v40  ;;  %v848_v48 = vcombine.high %v847_v45, %v847_v45  ;;  %v1049_v51 = vcombine.high %v756_v43, %v757_v44  ;;  %v555_v37 = vmul.f32 %v1652_v59, %v1652_v59 }
  0x71   : > { %v619_v38 = vsel %vm609_vm5, %v615_v36, 1.0  ;;  %v263_v39 = vsel %vm260_vm4, %v261_v1, %v262_v32  ;;  %v266_v40 = vsel %vm260_vm4, %v264_v49, %v265_v58  ;;  %1343 = vrcp.f32 %v395_v60 }
  0x72   : > { %v929_v54 = vcombine.high %v680_v42, %v681_v46  ;;  %v1056_v55 = vrot.slane %v1049_v51, %v1637_v41  ;;  %v850_v57 = vadd.f32 %v1224_v47, %v848_v48  ;;  %v558_v42 = vrot.slane %v554_v50, 1 }
  0x73   : > { %v684_v56 = vsel %vm682_vm3, %v1834_v4, 1.0  ;;  %v610_v43 = vsel %vm608_vm2, %v1834_v4, 1.0  ;;  %v632_v44 = vrot.slane %v618_v63, 7  ;;  %1345 = vrcp.f32 %v396_v2 }
  0x74   : > { %v936_v12 = vrot.slane %v929_v54, %v1637_v41  ;;  %v1057_v13 = vcombine.high %v1056_v55, %v1056_v55  ;;  %1225 = vst.msk [vmem:[%s1593_s6 + $0x3] ss:$8 sm:$0x3] %vm1673_vm11, %v850_v57  ;;  %v611_v46 = vsel %vm609_vm5, %v1839_v27, 1.0  ;;  %v633_v47 = vrot.slane %v619_v38, 7 }
  0x75   : > { %v559_v48 = vrot.slane %v555_v37, 1  ;;  %v685_v51 = vsel %vm683_vm6, %v1839_v27, 1.0  ;;  %v562_v57 = vadd.f32 %v558_v42, %v554_v50  ;;  %1347 = vrcp.f32 %v684_v56 }
  0x76   : > { %v937_v3 = vcombine.high %v936_v12, %v936_v12  ;;  %v1064_v10 = vrot.slane %v1057_v13, %v1637_v41  ;;  %v564_v12 = vrot.slane %v554_v50, 2  ;;  %v622_v13 = vrot.slane %v610_v43, 2 }
  0x77   : > { %1349 = vrcp.f32 %v632_v44  ;;  %v577_v9 = vrot.slane %v1627_v22, 2  ;;  %v706_v49 = vrot.slane %v1643_v52, 2  ;;  %v707_v50 = vrot.slane %v1645_v53, 2 }
  0x78   : > { %v944_v15 = vrot.slane %v937_v3, %v1637_v41  ;;  %v1066_v17 = vadd.f32 %v1242_v0, %v1064_v10  ;;  %v623_v10 = vrot.slane %v611_v46, 2  ;;  %1351 = vrcp.f32 %v633_v47 }
  0x79   : > { %1353 = vrcp.f32 %v685_v51  ;;  %v1864_v20 = vadd.f32 %v564_v12, %v562_v57  ;;  %vm505_vm4 = vcmask 1044480   ;;  %vm1903_vm8 = vcmp.ne.s32.totalorder %v577_v9, 0 }
  0x7a   : > { %v946_v18 = vadd.f32 %v1232_v14, %v944_v15  ;;  %1243 = vst.msk [vmem:[%s1593_s6 + $0x14] ss:$8 sm:$0x3] %vm1673_vm11, %v1066_v17  ;;  %v576_v14 = vrot.slane %v1625_v21, 2  ;;  %v565_v15 = vrot.slane %v555_v37, 2  ;;  %1355 = vrcp.f32 %v622_v13 }
  0x7b   : > { %1357 = vrcp.f32 %v623_v10 }
  0x7c   : > { %1233 = vst.msk [vmem:[%s1593_s6 + $0x7] ss:$8 sm:$0x3] %vm1673_vm11, %v946_v18  ;;  %v563_v18 = vadd.f32 %v559_v48, %v555_v37  ;;  %vm1899_vm7 = vcmp.ne.s32.totalorder %v576_v14, 0 }
  0x7e   : > { %v1869_v2 = vadd.f32 %v565_v15, %v563_v18  ;;  %v1344_v44 = vpop.eup %1343  ;;  %v722_v15 = vrot.slane %v1782_v29, 6 }
  0x80   : > { %v1346_v48 = vpop.eup %1345 }
  0x82   : > { %v1880_v10 = vpop.eup %1347 }
  0xae   : > { %v249_v45 = vpop.permute.xlu0 %248  ;;  %v278_v59 = vpop.permute.xlu1 %277 }
  0xaf   : > { %v271_v54 = vmul.f32 %v263_v39, %v249_v45  ;;  %v272_v55 = vmul.f32 %v266_v40, %v249_v45 }
  0xb1   : > { %v285_v3 = vadd.f32 %v278_v59, %v271_v54  ;;  %v286_v0 = vadd.f32 %v278_v59, %v272_v55 }
  0xb2   : > { %v254_v17 = vpop.permute.xlu0 %253  ;;  %v283_v36 = vpop.permute.xlu1 %282 }
  0xb3   : > { %v289_v19 = vsub.f32 %v1834_v4, %v285_v3  ;;  %v290_v24 = vsub.f32 %v1839_v27, %v286_v0  ;;  %v273_v26 = vmul.f32 %v262_v32, %v254_v17  ;;  %v274_v1 = vmul.f32 %v265_v58, %v254_v17 }
  0xb4   : > { %v702_v32 = vrot.slane %v1864_v20, 2  ;;  %v506_v42 = vrot.slane %v285_v3, 3  ;;  %v509_v54 = vrot.slane %v286_v0, 3  ;;  %v703_v3 = vrot.slane %v1869_v2, 2 }
  0xb5   : > { %v293_v28 = vand.u32 2147483647, %v289_v19  ;;  %v294_v35 = vand.u32 2147483647, %v290_v24  ;;  %v287_v60 = vadd.f32 %v283_v36, %v273_v26  ;;  %v288_v63 = vadd.f32 %v283_v36, %v274_v1  ;;  %v1350_v19 = vpop.eup %1349 }
  0xb6   : > { %v726_v1 = vrot.slane %v1777_v16, 5 }
  0xb7   : > { %v485_v37 = vmul.f32 %v293_v28, %v293_v28  ;;  %v361_v38 = vrot.slane %v293_v28, 1  ;;  %v362_v39 = vrot.slane %v294_v35, 1  ;;  %v291_v22 = vsub.f32 %v1827_v23, %v287_v60 }
  0xb8   : > { %v292_v58 = vsub.f32 %v1831_v25, %v288_v63  ;;  %v1874_v40 = vmul.f32 %v294_v35, %v294_v35  ;;  %v367_v56 = vrot.slane %v293_v28, 2  ;;  %v368_v43 = vrot.slane %v294_v35, 2 }
  0xb9   : > { %v365_v45 = vadd.f32 %v361_v38, %v293_v28  ;;  %v366_v46 = vadd.f32 %v362_v39, %v294_v35  ;;  %v295_v47 = vand.u32 2147483647, %v291_v22  ;;  %v489_v51 = vrot.slane %v485_v37, 1  ;;  %v1352_v28 = vpop.eup %1351 }
  0xba   : > { %v296_v59 = vand.u32 2147483647, %v292_v58  ;;  %v507_v55 = vrot.slane %v287_v60, 3  ;;  %v510_v57 = vrot.slane %v288_v63, 3  ;;  %v490_v0 = vrot.slane %v1874_v40, 1  ;;  %v1892_v38 = vpop.eup %1353 }
  0xbb   : > { %v1876_v12 = vadd.f32 %v367_v56, %v365_v45  ;;  %v1878_v23 = vadd.f32 %v368_v43, %v366_v46  ;;  %v465_v25 = vrot.slane %v295_v47, 2  ;;  %v493_v39 = vadd.f32 %v489_v51, %v485_v37  ;;  %v1356_v56 = vpop.eup %1355 }
  0xbc   : > { %v466_v13 = vrot.slane %v296_v59, 2  ;;  %v508_v17 = vsel %vm505_vm4, %v506_v42, %v507_v55  ;;  %v511_v18 = vsel %vm505_vm4, %v509_v54, %v510_v57  ;;  %v734_v42 = vrot.slane %v1791_v33, 5  ;;  %v1358_v47 = vpop.eup %1357 }
  0xbd   : > { %v399_v24 = vrot.slane %v1876_v12, 4  ;;  %v400_v26 = vrot.slane %v1878_v23, 4  ;;  %v469_v35 = vadd.f32 %v465_v25, %v365_v45  ;;  %v514_v60 = vsub.f32 %v1834_v4, %v508_v17 }
  0xbe   : > { %v470_v36 = vadd.f32 %v466_v13, %v366_v46  ;;  %v515_v63 = vsub.f32 %v1839_v27, %v511_v18  ;;  %v495_v45 = vrot.slane %v485_v37, 2  ;;  %v494_v21 = vadd.f32 %v490_v0, %v1874_v40 }
  0xbf   : > { %v403_v22 = vmul.f32 %v1606_v6, %v399_v24  ;;  %v404_v58 = vmul.f32 %v1609_v7, %v400_v26  ;;  %v516_v4 = vand.u32 2147483647, %v514_v60  ;;  %v637_v27 = vmul.f32 %v1350_v19, %v469_v35  ;;  %v758_v60 = vld [vmem:[%s1593_s6] ss:$8 sm:$0x3] }
  0xc0   : > { %v517_v46 = vand.u32 2147483647, %v515_v63  ;;  %v496_v6 = vrot.slane %v1874_v40, 2  ;;  %v639_v54 = vmul.f32 %v1352_v28, %v470_v36  ;;  %v499_v25 = vadd.f32 %v495_v45, %v493_v39 }
  0xc1   : > { %v406_v7 = vmul.f32 %v1344_v44, %v403_v22  ;;  %v408_v51 = vmul.f32 %v1346_v48, %v404_v58  ;;  %v518_v14 = vmul.f32 %v516_v4, %v516_v4  ;;  %v536_v57 = vrot.slane %v516_v4, 1 }
  0xc2   : > { %v519_v55 = vmul.f32 %v517_v46, %v517_v46  ;;  %v537_v13 = vrot.slane %v517_v46, 1  ;;  %v642_v17 = vrot.slane %v637_v27, 3  ;;  %v627_v9 = vmul.f32 %v1356_v56, %v1876_v12 }
  0xc3   : > { %v761_v37 = vcombine.high %v406_v7, %v408_v51  ;;  %v629_v18 = vmul.f32 %v1358_v47, %v1878_v23  ;;  %v522_v19 = vrot.slane %v518_v14, 1  ;;  %v528_v48 = vrot.slane %v518_v14, 2 }
  0xc4   : > { %v523_v24 = vrot.slane %v519_v55, 1  ;;  %v529_v26 = vrot.slane %v519_v55, 2  ;;  %v643_v28 = vrot.slane %v639_v54, 3  ;;  %v540_v35 = vadd.f32 %v536_v57, %v516_v4 }
  0xc5   : > { %v768_v44 = vrot.slane %v761_v37, %v1637_v41  ;;  %v526_v40 = vadd.f32 %v522_v19, %v518_v14  ;;  %v646_v36 = vadd.f32 %v642_v17, %v627_v9  ;;  %v500_v63 = vadd.f32 %v496_v6, %v494_v21  ;;  %v1226_v17 = vld [vmem:[%s1593_s6 + $0x4] ss:$8 sm:$0x3] }
  0xc6   : > { %v527_v0 = vadd.f32 %v523_v24, %v519_v55  ;;  %v541_v22 = vadd.f32 %v537_v13, %v517_v46  ;;  %v647_v58 = vadd.f32 %v643_v28, %v629_v18  ;;  %v542_v27 = vrot.slane %v516_v4, 2  ;;  %v1234_v28 = vld [vmem:[%s1593_s6 + $0x10] ss:$8 sm:$0x3] }
  0xc7   : > { %v775_v39 = vrot.slane %v768_v44, %v1637_v41  ;;  %v532_v56 = vadd.f32 %v528_v48, %v526_v40  ;;  %v650_v47 = vrot.slane %v646_v36, 6  ;;  %v723_v7 = vrot.slane %v1789_v31, 6  ;;  %v1238_v44 = vld [vmem:[%s1593_s6 + $0x12] ss:$8 sm:$0x3] }
  0xc8   : > { %v533_v45 = vadd.f32 %v529_v26, %v527_v0  ;;  %v543_v51 = vrot.slane %v517_v46, 2  ;;  %v651_v37 = vrot.slane %v647_v58, 6  ;;  %v727_v14 = vrot.slane %v1784_v30, 5  ;;  %v1240_v36 = vld [vmem:[%s1593_s6 + $0x13] ss:$8 sm:$0x3] }
  0xc9   : > { %v777_v54 = vadd.f32 %v775_v39, %v758_v60  ;;  %v546_v55 = vadd.f32 %v542_v27, %v540_v35  ;;  %vm570_vm9 = vcmp.lt.f32.partialorder %v532_v56, %v499_v25  ;;  %v735_v6 = vrot.slane %v1793_v34, 5 }
  0xca   : > { %vm571_vm10 = vcmp.lt.f32.partialorder %v533_v45, %v500_v63  ;;  %v547_v21 = vadd.f32 %v543_v51, %v541_v22  ;;  %vm580_vm12 = vmand %vm570_vm9, %vm1899_vm7  ;;  %v654_v57 = vmul.f32 %v1722_v61, %v650_v47  ;;  %v655_v4 = vmul.f32 %v1725_v62, %v651_v37 }
  0xcb   : > { %782 = vst.msk [vmem:[%s1593_s6] ss:$8 sm:$0x3] %vm1673_vm11, %v777_v54  ;;  %vm581_vm13 = vmand %vm571_vm10, %vm1903_vm8  ;;  %v686_v30 = vsel %vm580_vm12, %v546_v55, %v1876_v12  ;;  %v710_v31 = vsel %vm580_vm12, %v702_v32, %v706_v49  ;;  %v730_v61 = vsel %vm580_vm12, %v722_v15, %v726_v1 }
  0xcc   : > { %v687_v62 = vsel %vm581_vm13, %v547_v21, %v1878_v23  ;;  %v690_v34 = vrot.slane %v686_v30, 6  ;;  %v711_v43 = vsel %vm581_vm13, %v703_v3, %v707_v50  ;;  %v714_v46 = vrot.slane %v710_v31, 6 }
  0xcd   : > { %v691_v12 = vrot.slane %v687_v62, 6  ;;  %v715_v59 = vrot.slane %v711_v43, 6  ;;  %v731_v52 = vsel %vm581_vm13, %v723_v7, %v727_v14  ;;  %v738_v20 = vadd.f32 %v734_v42, %v730_v61 }
  0xce   : > { %v694_v16 = vmul.f32 %v1665_v5, %v690_v34  ;;  %v718_v29 = vmul.f32 %v1665_v5, %v714_v46  ;;  %v739_v49 = vadd.f32 %v735_v6, %v731_v52  ;;  %v857_v32 = vcombine.high %v654_v57, %v655_v4 }
  0xcf   : > { %v695_v23 = vmul.f32 %v1668_v8, %v691_v12  ;;  %v719_v53 = vmul.f32 %v1668_v8, %v715_v59  ;;  %v742_v2 = vrot.slane %v738_v20, 6 }
  0xd0   : > { %v697_v50 = vmul.f32 %v1880_v10, %v694_v16  ;;  %v743_v3 = vrot.slane %v739_v49, 6  ;;  %v864_v15 = vrot.slane %v857_v32, %v1637_v41 }
  0xd1   : > { %v699_v33 = vmul.f32 %v1892_v38, %v695_v23  ;;  %v746_v1 = vmul.f32 %v1665_v5, %v742_v2  ;;  %v1001_v42 = vcombine.high %v718_v29, %v719_v53 }
  0xd2   : > { %v747_v25 = vmul.f32 %v1668_v8, %v743_v3  ;;  %v865_v13 = vcombine.high %v864_v15, %v864_v15 }
  0xd3   : > { %v953_v9 = vcombine.high %v697_v50, %v699_v33  ;;  %v1008_v10 = vrot.slane %v1001_v42, %v1637_v41 }
  0xd4   : > { %v872_v18 = vrot.slane %v865_v13, %v1637_v41  ;;  %v1025_v19 = vcombine.high %v746_v1, %v747_v25 }
  0xd5   : > { %v960_v38 = vrot.slane %v953_v9, %v1637_v41  ;;  %v1009_v24 = vcombine.high %v1008_v10, %v1008_v10 }
  0xd6   : > { %v874_v5 = vadd.f32 %v1226_v17, %v872_v18  ;;  %v1032_v48 = vrot.slane %v1025_v19, %v1637_v41 }
  0xd7   : > { %v961_v8 = vcombine.high %v960_v38, %v960_v38  ;;  %v1016_v26 = vrot.slane %v1009_v24, %v1637_v41 }
  0xd8   : > { %1227 = vst.msk [vmem:[%s1593_s6 + $0x4] ss:$8 sm:$0x3] %vm1673_vm11, %v874_v5  ;;  %v1033_v40 = vcombine.high %v1032_v48, %v1032_v48 }
  0xd9   : > { %v968_v0 = vrot.slane %v961_v8, %v1637_v41  ;;  %v1018_v35 = vadd.f32 %v1238_v44, %v1016_v26 }
  0xda   : > { %v1040_v60 = vrot.slane %v1033_v40, %v1637_v41 }
  0xdb   : > { %v970_v63 = vadd.f32 %v1234_v28, %v968_v0  ;;  %1239 = vst.msk [vmem:[%s1593_s6 + $0x12] ss:$8 sm:$0x3] %vm1673_vm11, %v1018_v35 }
  0xdc   : > { %v1042_v39 = vadd.f32 %v1240_v36, %v1040_v60 }
  0xdd   : > { %1235 = vst.msk [vmem:[%s1593_s6 + $0x10] ss:$8 sm:$0x3] %vm1673_vm11, %v970_v63 }
  0xde   : > { %1241 = vst.msk [vmem:[%s1593_s6 + $0x13] ss:$8 sm:$0x3] %vm1673_vm11, %v1042_v39 }
  0xdf   : > { %1400 = shalt.err (!%p1397_p4)
}
  0xe0   : > { %s1401_s27 = scalar_lea.hbm %s1973_s16, 512  ;;  %s1405_s30 = scalar_lea.hbm %s2031_s2, 1024 }
  0xe1   : > { %p1402_p7 = scmp.ne.s32.totalorder %s1973_s16, %s1401_s27  ;;  %p1406_p2 = scmp.lt.s32.totalorder %s1973_s16, %s2031_s2 }
  0xe2   : > { %p1407_p12 = scmp.lt.s32.totalorder %s1405_s30, %s1401_s27 }
  0xe3   : > { %p1403_p10 = pnand %p1402_p7, %p1544_p9 }
  0xe4   : > { %p1408_p8 = por %p1407_p12, %p1406_p2 }
  0xe5   : > { %p1404_p13 = pneg %p1403_p10 }
  0xe7   : > { %p1409_p0 = pnand %p1408_p8, %p1404_p13 }
  0xe9   : > { %1412 = shalt.err (!%p1409_p0)
}
  0xea   : > { %s1476_s5 = smov 256   ;;  %s1477_s6 = smov 16  }
  0xeb   : > { %1258 = dma.vmem_to_hbm [thread:$0]  (%p1544_p9), %s1975_s7, 512, %s1973_s16, %s1094_s12, %s1476_s5, %s1476_s5, %s1477_s6  }
  0xec PF: > { %s1122_s21 = sand.u32 1, %s1447_s9   ;;  %p2043_p1 = scmp.ge.s32.totalorder %s1467_s14, 2 }
  0xed   : > { %s1123_s8 = scalar_lea.sflag [#allocation4], %s1122_s21 }
  0xee   : > { %p1265_p3 = pnand %p2043_p1, %p1551_p11 }
  0xf0   : > { %p1266_p5 = pneg %p1265_p3 }
  0xf2   : > { %1442 = dma.done.wait (%p1266_p5), %s1123_s8, 512  }
  0xf3   : > { %1444 = vsyncadd (%p1266_p5), %s1123_s8, 4294966784  ;;  %s18_s14 = sadd.s32 1, %s1467_s14   ;;  %s2044_s9 = smov %s1451_s10 }
  0xf4   : > { %p15_p6 = scmp.ge.s32.totalorder %s18_s14, 4   ;;  %s2045_s10 = smov %s1455_s11 }
  0xf5   : > { %s2046_s11 = smov %s1549_s23  ;;  %s2047_s12 = smov %s1463_s13 }
  0xf6   : > { %s2048_s13 = smov %s2050_s17  ;;  %17 = sbr.rel (!%p15_p6) target bundleno = 6 (0x6), region = 93 }
  0xfb   :  { %1128 = vsyncpa [#allocation3], 1 }
  0xfc   :  { %1130 = vsyncpa [#allocation3 + $0x1], 1 }
  0xfd   :  { %1131 = vsyncpa [#allocation4], 1 }
  0xfe   :  { %1133 = vsyncpa [#allocation4 + $0x1], 1 }

</bundles_post_ra>
